<compile_context>
chip_gen: v7x
topology: tpu7x:2x2x1
jax: 0.10.0
libtpu: 0.0.40
codegen_flags: <defaults>
</compile_context>

<pallas_src>
import functools

import jax
import jax.numpy as jnp
from jax.experimental import pallas as pl
from jax.experimental.pallas import tpu as pltpu

LANE = 128            # lane width: channel dims padded to a multiple of this
NODE_PAD = 256        # node count padded to a multiple of this
MAX_TM = 512          # max row tile
MAX_TK = 2048         # max reduction (column) tile
VMEM_CAP = 56 * 1024 * 1024   # safe on v7x (64 MiB/TC) and v5e/v6e (128 MiB)


# --------------------------------------------------------------------------
# Fused per-layer kernel:  out[i,:] = act( sum_k A[i,k] @ (X[k] @ W) + b )
# --------------------------------------------------------------------------
def _make_layer_kernel(apply_relu, x_resident, tk):
    def kernel(a_ref, x_ref, w_ref, b_ref, o_ref, acc_ref):
        k = pl.program_id(1)

        @pl.when(k == 0)
        def _():
            acc_ref[...] = jnp.zeros_like(acc_ref)

        if x_resident:
            # X is the whole padded array, resident in VMEM; slice the k tile.
            start = pl.multiple_of(k * tk, 256)
            x_tile = x_ref[pl.ds(start, tk), :]
        else:
            x_tile = x_ref[...]

        # Recompute the feature transform on-chip (MXU is idle in this
        # memory-bound kernel; W is VMEM-resident), then aggregate.
        xw = jnp.dot(x_tile, w_ref[...], preferred_element_type=jnp.float32)
        acc_ref[...] += jnp.dot(
            a_ref[...], xw.astype(jnp.bfloat16),
            preferred_element_type=jnp.float32,
        )

        # Epilogue once per output row tile: bias (+ReLU), narrow store.
        @pl.when(k == pl.num_programs(1) - 1)
        def _():
            out = acc_ref[...] + b_ref[...]
            if apply_relu:
                out = jnp.maximum(out, 0.0)
            o_ref[...] = out.astype(o_ref.dtype)

    return kernel


def _gcn_layer(a_pad, x_pad, w_pad, b_pad, *, tm, tk, apply_relu, out_dtype):
    n_pad = a_pad.shape[0]
    cin = x_pad.shape[1]
    cout = w_pad.shape[1]

    a_it = jnp.dtype(a_pad.dtype).itemsize
    x_it = jnp.dtype(x_pad.dtype).itemsize
    w_it = jnp.dtype(w_pad.dtype).itemsize
    o_it = jnp.dtype(out_dtype).itemsize

    # Working set excluding X (double-buffered inputs/outputs + accumulator).
    base = (2 * tm * tk * a_it          # A_hat tile x2
            + 2 * cin * cout * w_it     # resident W x2
            + 2 * cout * 4              # bias x2
            + 2 * tm * cout * o_it      # out tile x2
            + tm * cout * 4)            # f32 accumulator
    x_resident_bytes = 2 * n_pad * cin * x_it
    x_tiled_bytes = 2 * tk * cin * x_it

    # Keep X fully VMEM-resident when it fits; fall back to k-tiling otherwise.
    x_resident = (base + x_resident_bytes) <= VMEM_CAP
    if x_resident:
        x_spec = pl.BlockSpec((n_pad, cin), lambda i, k: (0, 0))
        work = base + x_resident_bytes
    else:
        x_spec = pl.BlockSpec((tk, cin), lambda i, k: (k, 0))
        work = base + x_tiled_bytes

    vmem_limit = int(min(max(work + 4 * 1024 * 1024, 16 * 1024 * 1024),
                         VMEM_CAP))

    return pl.pallas_call(
        _make_layer_kernel(apply_relu, x_resident, tk),
        out_shape=jax.ShapeDtypeStruct((n_pad, cout), out_dtype),
        grid_spec=pltpu.PrefetchScalarGridSpec(
            num_scalar_prefetch=0,
            grid=(n_pad // tm, n_pad // tk),
            in_specs=[
                pl.BlockSpec((tm, tk), lambda i, k: (i, k)),     # A_hat tile
                x_spec,                                          # X (resident or k-tiled)
                pl.BlockSpec((cin, cout), lambda i, k: (0, 0)),  # W (resident)
                pl.BlockSpec((1, cout), lambda i, k: (0, 0)),    # bias
            ],
            out_specs=pl.BlockSpec((tm, cout), lambda i, k: (i, 0)),
            scratch_shapes=[pltpu.VMEM((tm, cout), jnp.float32)],
        ),
        compiler_params=pltpu.CompilerParams(
            # Row axis shards across 2 TensorCores on v7x; k is the reduction.
            dimension_semantics=("parallel", "arbitrary"),
            vmem_limit_bytes=vmem_limit,
        ),
    )(a_pad, x_pad, w_pad, b_pad)


# --------------------------------------------------------------------------
# Forward pass
# --------------------------------------------------------------------------
def _round_up(x, m):
    return ((x + m - 1) // m) * m


def _pad2d(x, rows, cols):
    return jnp.pad(x, ((0, rows - x.shape[0]), (0, cols - x.shape[1])))


def _pick_tile(n_pad, max_tile, step=256):
    """Largest tile <= max_tile that divides n_pad (n_pad is a mult of 256)."""
    t = min(max_tile, n_pad)
    while n_pad % t != 0:
        t -= step
    return t


def prepare_adjacency(a_hat, pad_multiple=NODE_PAD):
    """Pad + bf16-cast the dense normalized adjacency ONCE per graph
    (hoisted out of the jitted forward per the perf review)."""
    n = a_hat.shape[0]
    n_pad = _round_up(n, pad_multiple)
    return _pad2d(a_hat, n_pad, n_pad).astype(jnp.bfloat16)


@jax.jit
def gcn_encoder(a_pad, x, w1, b1, w2, b2):
    """out = GCNConv2(relu(GCNConv1(x))), a_pad = prepare_adjacency(A_hat)."""
    n, cin = x.shape
    n_pad = a_pad.shape[0]
    hid = w1.shape[1]
    lat = w2.shape[1]

    cin_p = _round_up(cin, LANE)
    hid_p = _round_up(hid, LANE)
    lat_p = _round_up(lat, LANE)

    tm = _pick_tile(n_pad, MAX_TM)
    tk = _pick_tile(n_pad, MAX_TK)

    # Lane-dense bf16 operands (zero padding is exact: padded rows/cols of
    # A_hat, X and W are zero, so real outputs are unaffected).
    x_p = _pad2d(x, n_pad, cin_p).astype(jnp.bfloat16)
    w1_p = _pad2d(w1, cin_p, hid_p).astype(jnp.bfloat16)
    w2_p = _pad2d(w2, hid_p, lat_p).astype(jnp.bfloat16)
    b1_p = _pad2d(b1.reshape(1, -1), 1, hid_p).astype(jnp.float32)
    b2_p = _pad2d(b2.reshape(1, -1), 1, lat_p).astype(jnp.float32)

    # ---- layer 1: H = relu(A_hat @ (X @ W1) + b1) ----
    h = _gcn_layer(a_pad, x_p, w1_p, b1_p, tm=tm, tk=tk,
                   apply_relu=True, out_dtype=jnp.bfloat16)

    # ---- layer 2: out = A_hat @ (H @ W2) + b2 ----
    out = _gcn_layer(a_pad, h, w2_p, b2_p, tm=tm, tk=tk,
                     apply_relu=False, out_dtype=jnp.float32)

    return out[:n, :lat]


def gcn_encoder_reference(a_hat, x, w1, b1, w2, b2):
    """Plain-JAX f32 reference of the same forward pass."""
    h = jnp.maximum(a_hat @ (x @ w1) + b1, 0.0)
    return a_hat @ (h @ w2) + b2


# --------------------------------------------------------------------------
# Glue: adjacency + params (plain JAX, not the compute hot path)
# --------------------------------------------------------------------------
def build_normalized_adjacency(edge_index, num_nodes):
    """Dense A_hat = D^{-1/2}(A + I)D^{-1/2}, matching PyG GCNConv defaults."""
    src = edge_index[0]
    dst = edge_index[1]
    a = jnp.zeros((num_nodes, num_nodes), dtype=jnp.float32)
    a = a.at[dst, src].add(1.0)                      # message flows src -> dst
    a = a + jnp.eye(num_nodes, dtype=jnp.float32)    # add self loops
    deg = jnp.sum(a, axis=1)
    dinv = jnp.where(deg > 0, jax.lax.rsqrt(deg), 0.0)
    return dinv[:, None] * a * dinv[None, :]


def init_params(key, in_channels, hidden_channels, latent_channels):
    k1, k2 = jax.random.split(key)

    def glorot(k, fan_in, fan_out):
        limit = jnp.sqrt(6.0 / (fan_in + fan_out))
        return jax.random.uniform(k, (fan_in, fan_out), jnp.float32,
                                  minval=-limit, maxval=limit)

    w1 = glorot(k1, in_channels, hidden_channels)
    b1 = jnp.zeros((hidden_channels,), jnp.float32)
    w2 = glorot(k2, hidden_channels, latent_channels)
    b2 = jnp.zeros((latent_channels,), jnp.float32)
    return w1, b1, w2, b2


if __name__ == "__main__":
    key = jax.random.PRNGKey(0)
    k_x, k_e, k_p = jax.random.split(key, 3)

    # Small demo graph: 16 nodes, 8 in-features, 32 hidden, 16 latent.
    num_nodes = 16
    in_channels = 8
    hidden_channels = 32
    latent_channels = 16
    num_edges = 40

    x = jax.random.normal(k_x, (num_nodes, in_channels), jnp.float32)

    # Random directed edges without self loops (deterministic).
    ks, kd = jax.random.split(k_e)
    src = jax.random.randint(ks, (num_edges,), 0, num_nodes)
    off = jax.random.randint(kd, (num_edges,), 1, num_nodes)
    dst = (src + off) % num_nodes                    # guarantees src != dst
    edge_index = jnp.stack([src, dst], axis=0)       # [2, E]

    a_hat = build_normalized_adjacency(edge_index, num_nodes)
    a_pad = prepare_adjacency(a_hat)                 # pad + bf16 cast, once
    w1, b1, w2, b2 = init_params(k_p, in_channels, hidden_channels,
                                 latent_channels)

    out = gcn_encoder(a_pad, x, w1, b1, w2, b2)
    out = jax.block_until_ready(out)

    assert out.shape == (num_nodes, latent_channels)
    assert bool(jnp.all(jnp.isfinite(out)))

    # Check against the f32 reference (tolerance accounts for bf16 operands).
    ref = gcn_encoder_reference(a_hat, x, w1, b1, w2, b2)
    max_err = float(jnp.max(jnp.abs(out - ref)))
    assert max_err < 0.15, f"max abs err {max_err}"

    print("KERNEL_OK")
</pallas_src>

<mosaic_0001>
module attributes {stable_mosaic.version = 11 : i64} {
  func.func @kernel(%arg0: i32, %arg1: i32, %arg2: memref<256x256xbf16, #tpu.memory_space<vmem>>, %arg3: memref<256x128xbf16, #tpu.memory_space<vmem>>, %arg4: memref<128x128xbf16, #tpu.memory_space<vmem>>, %arg5: memref<1x128xf32, #tpu.memory_space<vmem>>, %arg6: memref<256x128xf32, #tpu.memory_space<vmem>>, %arg7: memref<256x128xf32, #tpu.memory_space<vmem>>) attributes {dimension_semantics = [#tpu.dimension_semantics<parallel>, #tpu.dimension_semantics<arbitrary>], iteration_bounds = array<i64: 1, 1>, scalar_prefetch = 0 : i64, scratch_operands = 1 : i64, tpu.core_type = #tpu.core_type<tc>, window_params = [{transform_indices = @transform_0, window_bounds = array<i64: 256, 256>}, {pipeline_mode = #tpu.pipeline_mode<synchronous>, transform_indices = @transform_1, window_bounds = array<i64: 256, 128>}, {pipeline_mode = #tpu.pipeline_mode<synchronous>, transform_indices = @transform_2, window_bounds = array<i64: 128, 128>}, {pipeline_mode = #tpu.pipeline_mode<synchronous>, transform_indices = @transform_3, window_bounds = array<i64: 1, 128>}, {transform_indices = @transform_4, window_bounds = array<i64: 256, 128>}]} {
    %c0_i32 = arith.constant 0 : i32
    %0 = arith.cmpi eq, %arg1, %c0_i32 : i32
    %1 = arith.extui %0 : i1 to i32
    %c0_i32_0 = arith.constant 0 : i32
    %2 = arith.cmpi ne, %1, %c0_i32_0 : i32
    scf.if %2 {
      %cst_12 = arith.constant 0.000000e+00 : f32
      %18 = vector.broadcast %cst_12 : f32 to vector<256x128xf32>
      %c0_13 = arith.constant 0 : index
      %c0_14 = arith.constant 0 : index
      %19 = vector.load %arg7[%c0_13, %c0_14] : memref<256x128xf32, #tpu.memory_space<vmem>>, vector<256x128xf32>
      tpu.vector_store %arg7[%c0_13, %c0_14], %18 {strides = array<i32>} : memref<256x128xf32, #tpu.memory_space<vmem>>, vector<256x128xf32>,
    } else {
    }
    %c256_i32 = arith.constant 256 : i32
    %3 = arith.muli %arg1, %c256_i32 : i32
    %4 = tpu.assume_multiple %3, 256 : i32
    %5 = arith.index_cast %4 : i32 to index
    %c0 = arith.constant 0 : index
    %6 = vector.load %arg3[%5, %c0] : memref<256x128xbf16, #tpu.memory_space<vmem>>, vector<256x128xbf16>
    %c0_1 = arith.constant 0 : index
    %c0_2 = arith.constant 0 : index
    %7 = vector.load %arg4[%c0_1, %c0_2] : memref<128x128xbf16, #tpu.memory_space<vmem>>, vector<128x128xbf16>
    %cst = arith.constant dense<0.000000e+00> : vector<256x128xf32>
    %8 = tpu.matmul %6, %7, %cst {dimension_numbers = #tpu.dot_dimension_numbers<[1], [0], [0], [1], [0, 0, 1, 1], [], []>} : vector<256x128xbf16>, vector<128x128xbf16>, vector<256x128xf32> -> vector<256x128xf32>
    %c0_3 = arith.constant 0 : index
    %c0_4 = arith.constant 0 : index
    %9 = vector.load %arg7[%c0_3, %c0_4] : memref<256x128xf32, #tpu.memory_space<vmem>>, vector<256x128xf32>
    %c0_5 = arith.constant 0 : index
    %c0_6 = arith.constant 0 : index
    %10 = vector.load %arg2[%c0_5, %c0_6] : memref<256x256xbf16, #tpu.memory_space<vmem>>, vector<256x256xbf16>
    %11 = arith.truncf %8 : vector<256x128xf32> to vector<256x128xbf16>
    %cst_7 = arith.constant dense<0.000000e+00> : vector<256x128xf32>
    %12 = tpu.matmul %10, %11, %cst_7 {dimension_numbers = #tpu.dot_dimension_numbers<[1], [0], [0], [1], [0, 0, 1, 1], [], []>} : vector<256x256xbf16>, vector<256x128xbf16>, vector<256x128xf32> -> vector<256x128xf32>
    %13 = arith.addf %9, %12 : vector<256x128xf32>
    %c0_8 = arith.constant 0 : index
    %c0_9 = arith.constant 0 : index
    %14 = vector.load %arg7[%c0_8, %c0_9] : memref<256x128xf32, #tpu.memory_space<vmem>>, vector<256x128xf32>
    tpu.vector_store %arg7[%c0_8, %c0_9], %13 {strides = array<i32>} : memref<256x128xf32, #tpu.memory_space<vmem>>, vector<256x128xf32>,
    %c0_i32_10 = arith.constant 0 : i32
    %15 = arith.cmpi eq, %arg1, %c0_i32_10 : i32
    %16 = arith.extui %15 : i1 to i32
    %c0_i32_11 = arith.constant 0 : i32
    %17 = arith.cmpi ne, %16, %c0_i32_11 : i32
    scf.if %17 {
      %c0_12 = arith.constant 0 : index
      %c0_13 = arith.constant 0 : index
      %18 = vector.load %arg7[%c0_12, %c0_13] : memref<256x128xf32, #tpu.memory_space<vmem>>, vector<256x128xf32>
      %c0_14 = arith.constant 0 : index
      %c0_15 = arith.constant 0 : index
      %19 = vector.load %arg5[%c0_14, %c0_15] : memref<1x128xf32, #tpu.memory_space<vmem>>, vector<1x128xf32>
      %20 = vector.broadcast %19 : vector<1x128xf32> to vector<256x128xf32>
      %21 = arith.addf %18, %20 : vector<256x128xf32>
      %c0_16 = arith.constant 0 : index
      %c0_17 = arith.constant 0 : index
      %22 = vector.load %arg6[%c0_16, %c0_17] : memref<256x128xf32, #tpu.memory_space<vmem>>, vector<256x128xf32>
      tpu.vector_store %arg6[%c0_16, %c0_17], %21 {strides = array<i32>} : memref<256x128xf32, #tpu.memory_space<vmem>>, vector<256x128xf32>,
    } else {
    }
    return
  }
  func.func @transform_0(%arg0: i32, %arg1: i32) -> (i32, i32) {
    %c0_i32 = arith.constant 0 : i32
    return %arg0, %arg1 : i32, i32
  }
  func.func @transform_1(%arg0: i32, %arg1: i32) -> (i32, i32) {
    %c0_i32 = arith.constant 0 : i32
    %c0_i32_0 = arith.constant 0 : i32
    %c0_i32_1 = arith.constant 0 : i32
    return %c0_i32, %c0_i32_0 : i32, i32
  }
  func.func @transform_2(%arg0: i32, %arg1: i32) -> (i32, i32) {
    %c0_i32 = arith.constant 0 : i32
    %c0_i32_0 = arith.constant 0 : i32
    %c0_i32_1 = arith.constant 0 : i32
    return %c0_i32, %c0_i32_0 : i32, i32
  }
  func.func @transform_3(%arg0: i32, %arg1: i32) -> (i32, i32) {
    %c0_i32 = arith.constant 0 : i32
    %c0_i32_0 = arith.constant 0 : i32
    %c0_i32_1 = arith.constant 0 : i32
    return %c0_i32, %c0_i32_0 : i32, i32
  }
  func.func @transform_4(%arg0: i32, %arg1: i32) -> (i32, i32) {
    %c0_i32 = arith.constant 0 : i32
    %c0_i32_0 = arith.constant 0 : i32
    return %arg0, %c0_i32 : i32, i32
  }
}

module attributes {stable_mosaic.version = 11 : i64} {
  func.func @kernel(%arg0: i32, %arg1: i32, %arg2: memref<256x256xbf16, #tpu.memory_space<vmem>>, %arg3: memref<256x128xbf16, #tpu.memory_space<vmem>>, %arg4: memref<128x128xbf16, #tpu.memory_space<vmem>>, %arg5: memref<1x128xf32, #tpu.memory_space<vmem>>, %arg6: memref<256x128xbf16, #tpu.memory_space<vmem>>, %arg7: memref<256x128xf32, #tpu.memory_space<vmem>>) attributes {dimension_semantics = [#tpu.dimension_semantics<parallel>, #tpu.dimension_semantics<arbitrary>], iteration_bounds = array<i64: 1, 1>, scalar_prefetch = 0 : i64, scratch_operands = 1 : i64, tpu.core_type = #tpu.core_type<tc>, window_params = [{transform_indices = @transform_0, window_bounds = array<i64: 256, 256>}, {pipeline_mode = #tpu.pipeline_mode<synchronous>, transform_indices = @transform_1, window_bounds = array<i64: 256, 128>}, {pipeline_mode = #tpu.pipeline_mode<synchronous>, transform_indices = @transform_2, window_bounds = array<i64: 128, 128>}, {pipeline_mode = #tpu.pipeline_mode<synchronous>, transform_indices = @transform_3, window_bounds = array<i64: 1, 128>}, {transform_indices = @transform_4, window_bounds = array<i64: 256, 128>}]} {
    %c0_i32 = arith.constant 0 : i32
    %0 = arith.cmpi eq, %arg1, %c0_i32 : i32
    %1 = arith.extui %0 : i1 to i32
    %c0_i32_0 = arith.constant 0 : i32
    %2 = arith.cmpi ne, %1, %c0_i32_0 : i32
    scf.if %2 {
      %cst_12 = arith.constant 0.000000e+00 : f32
      %18 = vector.broadcast %cst_12 : f32 to vector<256x128xf32>
      %c0_13 = arith.constant 0 : index
      %c0_14 = arith.constant 0 : index
      %19 = vector.load %arg7[%c0_13, %c0_14] : memref<256x128xf32, #tpu.memory_space<vmem>>, vector<256x128xf32>
      tpu.vector_store %arg7[%c0_13, %c0_14], %18 {strides = array<i32>} : memref<256x128xf32, #tpu.memory_space<vmem>>, vector<256x128xf32>,
    } else {
    }
    %c256_i32 = arith.constant 256 : i32
    %3 = arith.muli %arg1, %c256_i32 : i32
    %4 = tpu.assume_multiple %3, 256 : i32
    %5 = arith.index_cast %4 : i32 to index
    %c0 = arith.constant 0 : index
    %6 = vector.load %arg3[%5, %c0] : memref<256x128xbf16, #tpu.memory_space<vmem>>, vector<256x128xbf16>
    %c0_1 = arith.constant 0 : index
    %c0_2 = arith.constant 0 : index
    %7 = vector.load %arg4[%c0_1, %c0_2] : memref<128x128xbf16, #tpu.memory_space<vmem>>, vector<128x128xbf16>
    %cst = arith.constant dense<0.000000e+00> : vector<256x128xf32>
    %8 = tpu.matmul %6, %7, %cst {dimension_numbers = #tpu.dot_dimension_numbers<[1], [0], [0], [1], [0, 0, 1, 1], [], []>} : vector<256x128xbf16>, vector<128x128xbf16>, vector<256x128xf32> -> vector<256x128xf32>
    %c0_3 = arith.constant 0 : index
    %c0_4 = arith.constant 0 : index
    %9 = vector.load %arg7[%c0_3, %c0_4] : memref<256x128xf32, #tpu.memory_space<vmem>>, vector<256x128xf32>
    %c0_5 = arith.constant 0 : index
    %c0_6 = arith.constant 0 : index
    %10 = vector.load %arg2[%c0_5, %c0_6] : memref<256x256xbf16, #tpu.memory_space<vmem>>, vector<256x256xbf16>
    %11 = arith.truncf %8 : vector<256x128xf32> to vector<256x128xbf16>
    %cst_7 = arith.constant dense<0.000000e+00> : vector<256x128xf32>
    %12 = tpu.matmul %10, %11, %cst_7 {dimension_numbers = #tpu.dot_dimension_numbers<[1], [0], [0], [1], [0, 0, 1, 1], [], []>} : vector<256x256xbf16>, vector<256x128xbf16>, vector<256x128xf32> -> vector<256x128xf32>
    %13 = arith.addf %9, %12 : vector<256x128xf32>
    %c0_8 = arith.constant 0 : index
    %c0_9 = arith.constant 0 : index
    %14 = vector.load %arg7[%c0_8, %c0_9] : memref<256x128xf32, #tpu.memory_space<vmem>>, vector<256x128xf32>
    tpu.vector_store %arg7[%c0_8, %c0_9], %13 {strides = array<i32>} : memref<256x128xf32, #tpu.memory_space<vmem>>, vector<256x128xf32>,
    %c0_i32_10 = arith.constant 0 : i32
    %15 = arith.cmpi eq, %arg1, %c0_i32_10 : i32
    %16 = arith.extui %15 : i1 to i32
    %c0_i32_11 = arith.constant 0 : i32
    %17 = arith.cmpi ne, %16, %c0_i32_11 : i32
    scf.if %17 {
      %c0_12 = arith.constant 0 : index
      %c0_13 = arith.constant 0 : index
      %18 = vector.load %arg7[%c0_12, %c0_13] : memref<256x128xf32, #tpu.memory_space<vmem>>, vector<256x128xf32>
      %c0_14 = arith.constant 0 : index
      %c0_15 = arith.constant 0 : index
      %19 = vector.load %arg5[%c0_14, %c0_15] : memref<1x128xf32, #tpu.memory_space<vmem>>, vector<1x128xf32>
      %20 = vector.broadcast %19 : vector<1x128xf32> to vector<256x128xf32>
      %21 = arith.addf %18, %20 : vector<256x128xf32>
      %cst_16 = arith.constant 0.000000e+00 : f32
      %22 = vector.broadcast %cst_16 : f32 to vector<256x128xf32>
      %23 = arith.maximumf %21, %22 : vector<256x128xf32>
      %24 = arith.truncf %23 : vector<256x128xf32> to vector<256x128xbf16>
      %c0_17 = arith.constant 0 : index
      %c0_18 = arith.constant 0 : index
      %25 = vector.load %arg6[%c0_17, %c0_18] : memref<256x128xbf16, #tpu.memory_space<vmem>>, vector<256x128xbf16>
      tpu.vector_store %arg6[%c0_17, %c0_18], %24 {strides = array<i32>} : memref<256x128xbf16, #tpu.memory_space<vmem>>, vector<256x128xbf16>,
    } else {
    }
    return
  }
  func.func @transform_0(%arg0: i32, %arg1: i32) -> (i32, i32) {
    %c0_i32 = arith.constant 0 : i32
    return %arg0, %arg1 : i32, i32
  }
  func.func @transform_1(%arg0: i32, %arg1: i32) -> (i32, i32) {
    %c0_i32 = arith.constant 0 : i32
    %c0_i32_0 = arith.constant 0 : i32
    %c0_i32_1 = arith.constant 0 : i32
    return %c0_i32, %c0_i32_0 : i32, i32
  }
  func.func @transform_2(%arg0: i32, %arg1: i32) -> (i32, i32) {
    %c0_i32 = arith.constant 0 : i32
    %c0_i32_0 = arith.constant 0 : i32
    %c0_i32_1 = arith.constant 0 : i32
    return %c0_i32, %c0_i32_0 : i32, i32
  }
  func.func @transform_3(%arg0: i32, %arg1: i32) -> (i32, i32) {
    %c0_i32 = arith.constant 0 : i32
    %c0_i32_0 = arith.constant 0 : i32
    %c0_i32_1 = arith.constant 0 : i32
    return %c0_i32, %c0_i32_0 : i32, i32
  }
  func.func @transform_4(%arg0: i32, %arg1: i32) -> (i32, i32) {
    %c0_i32 = arith.constant 0 : i32
    %c0_i32_0 = arith.constant 0 : i32
    return %arg0, %c0_i32 : i32, i32
  }
}

</mosaic_0001>

<bundles_post_ra>
// kernel: gcn_encoder.3
= control target key start
LH: loop header
LB: loop body
LE: loop exit
PB: predicated region body
PF: predicated region fallthrough
CT: control target
= control target key end

     0   :  { %s1644_s2 = inlined_call_operand.vmem [shape: bf16[128,128], index: 2, kind: input, shape index: {}]   ;;  %s1645_s1 = inlined_call_operand.vmem [shape: bf16[256,128], index: 1, kind: input, shape index: {}]   ;;  %s1646_s0 = inlined_call_operand.vmem [shape: bf16[256,256], index: 0, kind: input, shape index: {}]   ;;  %s1647_s3 = inlined_call_operand.vmem [shape: f32[1,128], index: 3, kind: input, shape index: {}]   ;;  %s1648_s4 = inlined_call_operand.vmem [shape: f32[256,128], index: 4, kind: output, shape index: {}]  }
   0x1   :  { %v1246_v0 = vld [vmem:[%s1644_s2] sm:$0xff]   ;;  %v1247_v1 = vld [vmem:[%s1644_s2 + $0x8] sm:$0xff]   ;;  %v1248_v2 = vld [vmem:[%s1644_s2 + $0x10] sm:$0xff]  }
   0x2   :  { %1182 = vmatprep.subr.bf16.mxu0 %v1246_v0  ;;  %v1249_v3 = vld [vmem:[%s1644_s2 + $0x18] sm:$0xff]   ;;  %v1254_v4 = vld [vmem:[%s1645_s1] sm:$0xff]   ;;  %v1251_v6 = vld [vmem:[%s1644_s2 + $0x28] sm:$0xff]  }
   0x3   :  { %1183 = vmatpush3.bf16.msra.mxu0 %v1246_v0  ;;  %1198 = vmatprep.mubr.bf16.mxu0 %v1254_v4  ;;  %v1250_v5 = vld [vmem:[%s1644_s2 + $0x20] sm:$0xff]   ;;  %v1252_v7 = vld [vmem:[%s1644_s2 + $0x30] sm:$0xff]   ;;  %v1253_v8 = vld [vmem:[%s1644_s2 + $0x38] sm:$0xff]  }
   0x4   :  { %1184 = vmatprep.subr.bf16.mxu0 %v1247_v1  ;;  %v1255_v9 = vld [vmem:[%s1645_s1 + $0x8] sm:$0xff]   ;;  %v1256_v10 = vld [vmem:[%s1645_s1 + $0x10] sm:$0xff]   ;;  %v1257_v11 = vld [vmem:[%s1645_s1 + $0x18] sm:$0xff]  }
   0x5   :  { %v1258_v12 = vld [vmem:[%s1645_s1 + $0x20] sm:$0xff]   ;;  %v1259_v13 = vld [vmem:[%s1645_s1 + $0x28] sm:$0xff]   ;;  %v1260_v14 = vld [vmem:[%s1645_s1 + $0x30] sm:$0xff]  }
   0x6   :  { %v1261_v15 = vld [vmem:[%s1645_s1 + $0x38] sm:$0xff]   ;;  %v1262_v16 = vld [vmem:[%s1645_s1 + $0x40] sm:$0xff]   ;;  %v1263_v17 = vld [vmem:[%s1645_s1 + $0x48] sm:$0xff]  }
   0x7   :  { %1185 = vmatpush3.bf16.msra.mxu0 %v1247_v1  ;;  %v1264_v18 = vld [vmem:[%s1645_s1 + $0x50] sm:$0xff]   ;;  %v1265_v19 = vld [vmem:[%s1645_s1 + $0x58] sm:$0xff]   ;;  %v1266_v20 = vld [vmem:[%s1645_s1 + $0x60] sm:$0xff]  }
   0x8   :  { %1186 = vmatprep.subr.bf16.mxu0 %v1248_v2  ;;  %v1267_v21 = vld [vmem:[%s1645_s1 + $0x68] sm:$0xff]   ;;  %v1268_v22 = vld [vmem:[%s1645_s1 + $0x70] sm:$0xff]   ;;  %v1269_v23 = vld [vmem:[%s1645_s1 + $0x78] sm:$0xff]  }
   0x9   :  { %v1272_v24 = vld [vmem:[%s1646_s0 + $0x44] ss:$8 sps:$4 sm:$0xff]  }
   0xa   :  { %716 = vmatprep.mubr.bf16.mxu1 %v1272_v24  ;;  %v1296_v25 = vld [vmem:[%s1646_s0 + $0x4] ss:$8 sps:$4 sm:$0xff]  }
   0xb   :  { %1187 = vmatpush3.bf16.msra.mxu0 %v1248_v2  ;;  %v1282_v24 = vld [vmem:[%s1646_s0 + $0x84] ss:$8 sps:$4 sm:$0xff]  }
   0xc   :  { %1188 = vmatprep.subr.bf16.mxu0 %v1249_v3 }
   0xf   :  { %1189 = vmatpush3.bf16.msra.mxu0 %v1249_v3 }
  0x10   :  { %1190 = vmatprep.subr.bf16.mxu0 %v1250_v5 }
  0x13   :  { %1191 = vmatpush3.bf16.msra.mxu0 %v1250_v5 }
  0x14   :  { %1192 = vmatprep.subr.bf16.mxu0 %v1251_v6 }
  0x17   :  { %1193 = vmatpush3.bf16.msra.mxu0 %v1251_v6 }
  0x18   :  { %1194 = vmatprep.subr.bf16.mxu0 %v1252_v7 }
  0x1b   :  { %1195 = vmatpush3.bf16.msra.mxu0 %v1252_v7 }
  0x1c   :  { %1196 = vmatprep.subr.bf16.mxu0 %v1253_v8 }
  0x1f   :  { %1197 = vmatpush3.bf16.msra.mxu0 %v1253_v8 }
  0x22   :  { %1199 = vmatmul.mubr.bf16.vlgmr.msra.gmra.mrb[0].mxu0 %v1255_v9 }
  0x23   :  { %1202 = vmatprep.mubr.bf16.mxu0 %v1256_v10  ;;  %v1270_v10 = vld [vmem:[%s1646_s0 + $0x40] ss:$8 sps:$4 sm:$0xff]  }
  0x2a   :  { %1203 = vmatmul.mubr.bf16.gmra.mrb[4].mxu0 %v1257_v11  ;;  %v1294_v11 = vld [vmem:[%s1646_s0] ss:$8 sps:$4 sm:$0xff]  }
  0x2b   :  { %1206 = vmatprep.mubr.bf16.mxu0 %v1258_v12  ;;  %v1273_v12 = vld [vmem:[%s1646_s0 + $0x54] ss:$8 sps:$4 sm:$0xff]  }
  0x32   :  { %1207 = vmatmul.mubr.bf16.gmra.mrb[8].mxu0 %v1259_v13  ;;  %v1300_v13 = vld [vmem:[%s1646_s0 + $0x14] ss:$8 sps:$4 sm:$0xff]  }
  0x33   :  { %1210 = vmatprep.mubr.bf16.mxu0 %v1260_v14  ;;  %v1275_v14 = vld [vmem:[%s1646_s0 + $0x50] ss:$8 sps:$4 sm:$0xff]  }
  0x3a   :  { %1211 = vmatmul.mubr.bf16.gmra.mrb[12].mxu0 %v1261_v15  ;;  %v1302_v15 = vld [vmem:[%s1646_s0 + $0x10] ss:$8 sps:$4 sm:$0xff]  }
  0x3b   :  { %1214 = vmatprep.mubr.bf16.mxu0 %v1262_v16  ;;  %v1276_v16 = vld [vmem:[%s1646_s0 + $0x64] ss:$8 sps:$4 sm:$0xff]  }
  0x42   :  { %1215 = vmatmul.mubr.bf16.gmra.mrb[16].mxu0 %v1263_v17  ;;  %v1306_v17 = vld [vmem:[%s1646_s0 + $0x24] ss:$8 sps:$4 sm:$0xff]  }
  0x43   :  { %1218 = vmatprep.mubr.bf16.mxu0 %v1264_v18  ;;  %v1278_v18 = vld [vmem:[%s1646_s0 + $0x60] ss:$8 sps:$4 sm:$0xff]  }
  0x4a   :  { %1219 = vmatmul.mubr.bf16.gmra.mrb[20].mxu0 %v1265_v19  ;;  %v1308_v19 = vld [vmem:[%s1646_s0 + $0x20] ss:$8 sps:$4 sm:$0xff]  }
  0x4b   :  { %1222 = vmatprep.mubr.bf16.mxu0 %v1266_v20  ;;  %v1279_v20 = vld [vmem:[%s1646_s0 + $0x74] ss:$8 sps:$4 sm:$0xff]  }
  0x52   :  { %1223 = vmatmul.mubr.bf16.gmra.mrb[24].mxu0 %v1267_v21  ;;  %v1312_v21 = vld [vmem:[%s1646_s0 + $0x34] ss:$8 sps:$4 sm:$0xff]  }
  0x53   :  { %1226 = vmatprep.mubr.bf16.mxu0 %v1268_v22  ;;  %v1281_v22 = vld [vmem:[%s1646_s0 + $0x70] ss:$8 sps:$4 sm:$0xff]  }
  0x5a   :  { %1227 = vmatmul.mubr.bf16.gmra.mrb[28].mxu0 %v1269_v23  ;;  %v1314_v23 = vld [vmem:[%s1646_s0 + $0x30] ss:$8 sps:$4 sm:$0xff]  }
  0x5b   :  { %684 = vmatprep.mubr.bf16.mxu0 %v1296_v25  ;;  %v1284_v25 = vld [vmem:[%s1646_s0 + $0x80] ss:$8 sps:$4 sm:$0xff]  }
  0xf5   :  { %v1200_v26 = vpop.f32.mrb[0].mxu0 }
  0xf6   :  { %v285_v27 = vpop.f32.mrb[1].mxu0 }
  0xf7   :  { %v1201_v28 = vpop.f32.mrb[2].mxu0 }
  0xf8   :  { %v477_v29 = vpack.c.bf16 %v1201_v28, %v1200_v26  ;;  %v288_v30 = vpop.f32.mrb[3].mxu0  ;;  %v1285_v26 = vld [vmem:[%s1646_s0 + $0x94] ss:$8 sps:$4 sm:$0xff]   ;;  %v1288_v28 = vld [vmem:[%s1646_s0 + $0xa4] ss:$8 sps:$4 sm:$0xff]  }
  0xf9   :  { %v476_v31 = vpack.c.bf16 %v288_v30, %v285_v27  ;;  %v1287_v27 = vld [vmem:[%s1646_s0 + $0x90] ss:$8 sps:$4 sm:$0xff]   ;;  %v1291_v30 = vld [vmem:[%s1646_s0 + $0xb4] ss:$8 sps:$4 sm:$0xff]  }
  0xfd   :  { %v1204_v32 = vpop.f32.mrb[4].mxu0 }
  0xfe   :  { %v301_v33 = vpop.f32.mrb[5].mxu0 }
  0xff   :  { %v1205_v34 = vpop.f32.mrb[6].mxu0 }
 0x100   :  { %v479_v35 = vpack.c.bf16 %v1205_v34, %v1204_v32  ;;  %v304_v36 = vpop.f32.mrb[7].mxu0  ;;  %v1297_v32 = vld [vmem:[%s1646_s0 + $0xc4] ss:$8 sps:$4 sm:$0xff]   ;;  %v1303_v34 = vld [vmem:[%s1646_s0 + $0xd4] ss:$8 sps:$4 sm:$0xff]  }
 0x101   :  { %v478_v37 = vpack.c.bf16 %v304_v36, %v301_v33  ;;  %v1299_v33 = vld [vmem:[%s1646_s0 + $0xc0] ss:$8 sps:$4 sm:$0xff]   ;;  %v1309_v36 = vld [vmem:[%s1646_s0 + $0xe4] ss:$8 sps:$4 sm:$0xff]  }
 0x105   :  { %v1208_v38 = vpop.f32.mrb[8].mxu0 }
 0x106   :  { %v317_v39 = vpop.f32.mrb[9].mxu0 }
 0x107   :  { %v1209_v40 = vpop.f32.mrb[10].mxu0 }
 0x108   :  { %v481_v41 = vpack.c.bf16 %v1209_v40, %v1208_v38  ;;  %v320_v42 = vpop.f32.mrb[11].mxu0  ;;  %v1315_v38 = vld [vmem:[%s1646_s0 + $0xf4] ss:$8 sps:$4 sm:$0xff]  }
 0x109   :  { %v480_v43 = vpack.c.bf16 %v320_v42, %v317_v39  ;;  %v1317_v39 = vld [vmem:[%s1646_s0 + $0xf0] ss:$8 sps:$4 sm:$0xff]  }
 0x10d   :  { %v1212_v44 = vpop.f32.mrb[12].mxu0 }
 0x10e   :  { %v333_v45 = vpop.f32.mrb[13].mxu0 }
 0x10f   :  { %v1213_v46 = vpop.f32.mrb[14].mxu0 }
 0x110   :  { %v483_v47 = vpack.c.bf16 %v1213_v46, %v1212_v44  ;;  %v336_v48 = vpop.f32.mrb[15].mxu0 }
 0x111   :  { %v482_v49 = vpack.c.bf16 %v336_v48, %v333_v45 }
 0x115   :  { %v1216_v50 = vpop.f32.mrb[16].mxu0 }
 0x116   :  { %v349_v51 = vpop.f32.mrb[17].mxu0 }
 0x117   :  { %v1217_v52 = vpop.f32.mrb[18].mxu0 }
 0x118   :  { %v485_v53 = vpack.c.bf16 %v1217_v52, %v1216_v50  ;;  %v352_v54 = vpop.f32.mrb[19].mxu0 }
 0x119   :  { %v484_v55 = vpack.c.bf16 %v352_v54, %v349_v51 }
 0x11b   :  { %1070 = vmatprep.subr.bf16.mxu0 %v484_v55  ;;  %1230 = vmatprep.subr.bf16.mxu1 %v484_v55 }
 0x11c   :  { %1071 = vmatpush3.bf16.msra.mxu0 %v476_v31  ;;  %1238 = vmatpush3.bf16.msra.mxu1 %v476_v31  ;;  %v1293_v31 = vld [vmem:[%s1646_s0 + $0xb0] ss:$8 sps:$4 sm:$0xff]  }
 0x11d   :  { %v1220_v56 = vpop.f32.mrb[20].mxu0  ;;  %1072 = vmatprep.subr.bf16.mxu0 %v485_v53  ;;  %1231 = vmatprep.subr.bf16.mxu1 %v485_v53 }
 0x11e   :  { %v365_v57 = vpop.f32.mrb[21].mxu0 }
 0x11f   :  { %v1221_v58 = vpop.f32.mrb[22].mxu0 }
 0x120   :  { %v487_v59 = vpack.c.bf16 %v1221_v58, %v1220_v56  ;;  %v368_v60 = vpop.f32.mrb[23].mxu0  ;;  %1073 = vmatpush3.bf16.msra.mxu0 %v477_v29  ;;  %1239 = vmatpush3.bf16.msra.mxu1 %v477_v29  ;;  %v1290_v29 = vld [vmem:[%s1646_s0 + $0xa0] ss:$8 sps:$4 sm:$0xff]  }
 0x121   :  { %v486_v61 = vpack.c.bf16 %v368_v60, %v365_v57 }
 0x123   :  { %1074 = vmatprep.subr.bf16.mxu0 %v486_v61  ;;  %1232 = vmatprep.subr.bf16.mxu1 %v486_v61 }
 0x124   :  { %1075 = vmatpush3.bf16.msra.mxu0 %v478_v37  ;;  %1240 = vmatpush3.bf16.msra.mxu1 %v478_v37  ;;  %v1311_v37 = vld [vmem:[%s1646_s0 + $0xe0] ss:$8 sps:$4 sm:$0xff]  }
 0x125   :  { %v1224_v62 = vpop.f32.mrb[24].mxu0  ;;  %1076 = vmatprep.subr.bf16.mxu0 %v487_v59  ;;  %1233 = vmatprep.subr.bf16.mxu1 %v487_v59 }
 0x126   :  { %v381_v63 = vpop.f32.mrb[25].mxu0 }
 0x127   :  { %v1225_v0 = vpop.f32.mrb[26].mxu0 }
 0x128   :  { %v489_v1 = vpack.c.bf16 %v1225_v0, %v1224_v62  ;;  %v384_v2 = vpop.f32.mrb[27].mxu0  ;;  %1077 = vmatpush3.bf16.msra.mxu0 %v479_v35  ;;  %1241 = vmatpush3.bf16.msra.mxu1 %v479_v35  ;;  %v1305_v35 = vld [vmem:[%s1646_s0 + $0xd0] ss:$8 sps:$4 sm:$0xff]  }
 0x129   :  { %v488_v3 = vpack.c.bf16 %v384_v2, %v381_v63 }
 0x12b   :  { %1078 = vmatprep.subr.bf16.mxu0 %v488_v3  ;;  %1234 = vmatprep.subr.bf16.mxu1 %v488_v3 }
 0x12c   :  { %1079 = vmatpush3.bf16.msra.mxu0 %v480_v43  ;;  %1242 = vmatpush3.bf16.msra.mxu1 %v480_v43  ;;  %v1514_v43 = vld [vmem:[%s1647_s3] ss:$0 sm:$0xff] }
 0x12d   :  { %v1228_v4 = vpop.f32.mrb[28].mxu0  ;;  %1080 = vmatprep.subr.bf16.mxu0 %v489_v1  ;;  %1235 = vmatprep.subr.bf16.mxu1 %v489_v1 }
 0x12e   :  { %v397_v5 = vpop.f32.mrb[29].mxu0 }
 0x12f   :  { %v1229_v6 = vpop.f32.mrb[30].mxu0 }
 0x130   :  { %v491_v7 = vpack.c.bf16 %v1229_v6, %v1228_v4  ;;  %v400_v8 = vpop.f32.mrb[31].mxu0  ;;  %1081 = vmatpush3.bf16.msra.mxu0 %v481_v41  ;;  %1243 = vmatpush3.bf16.msra.mxu1 %v481_v41 }
 0x131   :  { %v490_v9 = vpack.c.bf16 %v400_v8, %v397_v5 }
 0x133   :  { %1082 = vmatprep.subr.bf16.mxu0 %v490_v9  ;;  %1236 = vmatprep.subr.bf16.mxu1 %v490_v9 }
 0x134   :  { %1083 = vmatpush3.bf16.msra.mxu0 %v482_v49  ;;  %1244 = vmatpush3.bf16.msra.mxu1 %v482_v49 }
 0x135   :  { %1084 = vmatprep.subr.bf16.mxu0 %v491_v7  ;;  %1237 = vmatprep.subr.bf16.mxu1 %v491_v7 }
 0x138   :  { %1085 = vmatpush3.bf16.msra.mxu0 %v483_v47  ;;  %1245 = vmatpush3.bf16.msra.mxu1 %v483_v47 }
 0x13b   :  { %717 = vmatmul.mubr.bf16.vlgmr.msra.gmra.mrb[0].mxu1 %v1270_v10  ;;  %685 = vmatmul.mubr.bf16.vlgmr.msra.gmra.mrb[32].mxu0 %v1294_v11 }
 0x13c   :  { %724 = vmatprep.mubr.bf16.mxu1 %v1273_v12  ;;  %692 = vmatprep.mubr.bf16.mxu0 %v1300_v13 }
 0x143   :  { %725 = vmatmul.mubr.bf16.gmra.mrb[4].mxu1 %v1275_v14  ;;  %693 = vmatmul.mubr.bf16.gmra.mrb[36].mxu0 %v1302_v15 }
 0x144   :  { %732 = vmatprep.mubr.bf16.mxu1 %v1276_v16  ;;  %700 = vmatprep.mubr.bf16.mxu0 %v1306_v17 }
 0x14b   :  { %733 = vmatmul.mubr.bf16.gmra.mrb[8].mxu1 %v1278_v18  ;;  %701 = vmatmul.mubr.bf16.gmra.mrb[40].mxu0 %v1308_v19 }
 0x14c   :  { %740 = vmatprep.mubr.bf16.mxu1 %v1279_v20  ;;  %708 = vmatprep.mubr.bf16.mxu0 %v1312_v21 }
 0x153   :  { %741 = vmatmul.mubr.bf16.gmra.mrb[12].mxu1 %v1281_v22  ;;  %709 = vmatmul.mubr.bf16.gmra.mrb[44].mxu0 %v1314_v23 }
 0x154   :  { %748 = vmatprep.mubr.bf16.mxu1 %v1282_v24 }
 0x15b   :  { %749 = vmatmul.mubr.bf16.gmra.mrb[16].mxu1 %v1284_v25 }
 0x15c   :  { %756 = vmatprep.mubr.bf16.mxu1 %v1285_v26 }
 0x163   :  { %757 = vmatmul.mubr.bf16.gmra.mrb[20].mxu1 %v1287_v27 }
 0x164   :  { %764 = vmatprep.mubr.bf16.mxu1 %v1288_v28 }
 0x16b   :  { %765 = vmatmul.mubr.bf16.gmra.mrb[24].mxu1 %v1290_v29 }
 0x16c   :  { %772 = vmatprep.mubr.bf16.mxu1 %v1291_v30 }
 0x173   :  { %773 = vmatmul.mubr.bf16.gmra.mrb[28].mxu1 %v1293_v31 }
 0x174   :  { %780 = vmatprep.mubr.bf16.mxu1 %v1297_v32 }
 0x17b   :  { %781 = vmatmul.mubr.bf16.gmra.mrb[32].mxu1 %v1299_v33 }
 0x17c   :  { %788 = vmatprep.mubr.bf16.mxu1 %v1303_v34 }
 0x183   :  { %789 = vmatmul.mubr.bf16.gmra.mrb[36].mxu1 %v1305_v35 }
 0x184   :  { %796 = vmatprep.mubr.bf16.mxu1 %v1309_v36 }
 0x18b   :  { %797 = vmatmul.mubr.bf16.gmra.mrb[40].mxu1 %v1311_v37 }
 0x18c   :  { %804 = vmatprep.mubr.bf16.mxu1 %v1315_v38 }
 0x193   :  { %805 = vmatmul.mubr.bf16.gmra.mrb[44].mxu1 %v1317_v39 }
 0x20e   :  { %v1110_v40 = vpop.f32.mrb[0].mxu1  ;;  %v1086_v41 = vpop.f32.mrb[32].mxu0 }
 0x20f   :  { %v1111_v42 = vpop.f32.mrb[1].mxu1  ;;  %v1087_v44 = vpop.f32.mrb[33].mxu0 }
 0x210   :  { %v1112_v45 = vadd.f32 %v1111_v42, %v1110_v40  ;;  %v1113_v46 = vpop.f32.mrb[2].mxu1  ;;  %v1088_v47 = vadd.f32 %v1087_v44, %v1086_v41  ;;  %v1089_v48 = vpop.f32.mrb[34].mxu0 }
 0x211   :  { %v1114_v49 = vpop.f32.mrb[3].mxu1  ;;  %v1090_v50 = vpop.f32.mrb[35].mxu0 }
 0x212   :  { %v927_v51 = vadd.f32 %v1112_v45, %v1514_v43  ;;  %v1115_v52 = vadd.f32 %v1114_v49, %v1113_v46  ;;  %v919_v53 = vadd.f32 %v1088_v47, %v1514_v43  ;;  %v1091_v54 = vadd.f32 %v1090_v50, %v1089_v48 }
 0x214   :  { %959 = vst [vmem:[%s1648_s4 + $0x40] sm:$0xff] %v927_v51  ;;  %v928_v55 = vadd.f32 %v1115_v52, %v1514_v43  ;;  %951 = vst [vmem:[%s1648_s4] sm:$0xff] %v919_v53  ;;  %v920_v56 = vadd.f32 %v1091_v54, %v1514_v43 }
 0x216   :  { %960 = vst [vmem:[%s1648_s4 + $0x48] sm:$0xff] %v928_v55  ;;  %v1116_v57 = vpop.f32.mrb[4].mxu1  ;;  %952 = vst [vmem:[%s1648_s4 + $0x8] sm:$0xff] %v920_v56  ;;  %v1092_v58 = vpop.f32.mrb[36].mxu0 }
 0x217   :  { %v1117_v59 = vpop.f32.mrb[5].mxu1  ;;  %v1093_v60 = vpop.f32.mrb[37].mxu0 }
 0x218   :  { %v1118_v61 = vadd.f32 %v1117_v59, %v1116_v57  ;;  %v1119_v62 = vpop.f32.mrb[6].mxu1  ;;  %v1094_v63 = vadd.f32 %v1093_v60, %v1092_v58  ;;  %v1095_v0 = vpop.f32.mrb[38].mxu0 }
 0x219   :  { %v1120_v1 = vpop.f32.mrb[7].mxu1  ;;  %v1096_v2 = vpop.f32.mrb[39].mxu0 }
 0x21a   :  { %v929_v3 = vadd.f32 %v1118_v61, %v1514_v43  ;;  %v1121_v4 = vadd.f32 %v1120_v1, %v1119_v62  ;;  %v921_v5 = vadd.f32 %v1094_v63, %v1514_v43  ;;  %v1097_v6 = vadd.f32 %v1096_v2, %v1095_v0 }
 0x21c   :  { %961 = vst [vmem:[%s1648_s4 + $0x50] sm:$0xff] %v929_v3  ;;  %v930_v7 = vadd.f32 %v1121_v4, %v1514_v43  ;;  %953 = vst [vmem:[%s1648_s4 + $0x10] sm:$0xff] %v921_v5  ;;  %v922_v8 = vadd.f32 %v1097_v6, %v1514_v43 }
 0x21e   :  { %962 = vst [vmem:[%s1648_s4 + $0x58] sm:$0xff] %v930_v7  ;;  %v1122_v9 = vpop.f32.mrb[8].mxu1  ;;  %954 = vst [vmem:[%s1648_s4 + $0x18] sm:$0xff] %v922_v8  ;;  %v1098_v10 = vpop.f32.mrb[40].mxu0 }
 0x21f   :  { %v1123_v11 = vpop.f32.mrb[9].mxu1  ;;  %v1099_v12 = vpop.f32.mrb[41].mxu0 }
 0x220   :  { %v1124_v13 = vadd.f32 %v1123_v11, %v1122_v9  ;;  %v1125_v14 = vpop.f32.mrb[10].mxu1  ;;  %v1100_v15 = vadd.f32 %v1099_v12, %v1098_v10  ;;  %v1101_v16 = vpop.f32.mrb[42].mxu0 }
 0x221   :  { %v1126_v17 = vpop.f32.mrb[11].mxu1  ;;  %v1102_v18 = vpop.f32.mrb[43].mxu0 }
 0x222   :  { %v931_v19 = vadd.f32 %v1124_v13, %v1514_v43  ;;  %v1127_v20 = vadd.f32 %v1126_v17, %v1125_v14  ;;  %v923_v21 = vadd.f32 %v1100_v15, %v1514_v43  ;;  %v1103_v22 = vadd.f32 %v1102_v18, %v1101_v16 }
 0x224   :  { %963 = vst [vmem:[%s1648_s4 + $0x60] sm:$0xff] %v931_v19  ;;  %v932_v23 = vadd.f32 %v1127_v20, %v1514_v43  ;;  %955 = vst [vmem:[%s1648_s4 + $0x20] sm:$0xff] %v923_v21  ;;  %v924_v24 = vadd.f32 %v1103_v22, %v1514_v43 }
 0x226   :  { %964 = vst [vmem:[%s1648_s4 + $0x68] sm:$0xff] %v932_v23  ;;  %v1128_v25 = vpop.f32.mrb[12].mxu1  ;;  %956 = vst [vmem:[%s1648_s4 + $0x28] sm:$0xff] %v924_v24  ;;  %v1104_v26 = vpop.f32.mrb[44].mxu0 }
 0x227   :  { %v1129_v27 = vpop.f32.mrb[13].mxu1  ;;  %v1105_v28 = vpop.f32.mrb[45].mxu0 }
 0x228   :  { %v1130_v29 = vadd.f32 %v1129_v27, %v1128_v25  ;;  %v1131_v30 = vpop.f32.mrb[14].mxu1  ;;  %v1106_v31 = vadd.f32 %v1105_v28, %v1104_v26  ;;  %v1107_v32 = vpop.f32.mrb[46].mxu0 }
 0x229   :  { %v1132_v33 = vpop.f32.mrb[15].mxu1  ;;  %v1108_v34 = vpop.f32.mrb[47].mxu0 }
 0x22a   :  { %v933_v35 = vadd.f32 %v1130_v29, %v1514_v43  ;;  %v1133_v36 = vadd.f32 %v1132_v33, %v1131_v30  ;;  %v925_v37 = vadd.f32 %v1106_v31, %v1514_v43  ;;  %v1109_v38 = vadd.f32 %v1108_v34, %v1107_v32 }
 0x22c   :  { %965 = vst [vmem:[%s1648_s4 + $0x70] sm:$0xff] %v933_v35  ;;  %v934_v39 = vadd.f32 %v1133_v36, %v1514_v43  ;;  %957 = vst [vmem:[%s1648_s4 + $0x30] sm:$0xff] %v925_v37  ;;  %v926_v40 = vadd.f32 %v1109_v38, %v1514_v43 }
 0x22e   :  { %966 = vst [vmem:[%s1648_s4 + $0x78] sm:$0xff] %v934_v39  ;;  %v1134_v41 = vpop.f32.mrb[16].mxu1  ;;  %958 = vst [vmem:[%s1648_s4 + $0x38] sm:$0xff] %v926_v40 }
 0x22f   :  { %v1135_v42 = vpop.f32.mrb[17].mxu1 }
 0x230   :  { %v1136_v44 = vadd.f32 %v1135_v42, %v1134_v41  ;;  %v1137_v45 = vpop.f32.mrb[18].mxu1 }
 0x231   :  { %v1138_v46 = vpop.f32.mrb[19].mxu1 }
 0x232   :  { %v935_v47 = vadd.f32 %v1136_v44, %v1514_v43  ;;  %v1139_v48 = vadd.f32 %v1138_v46, %v1137_v45 }
 0x234   :  { %967 = vst [vmem:[%s1648_s4 + $0x80] sm:$0xff] %v935_v47  ;;  %v936_v49 = vadd.f32 %v1139_v48, %v1514_v43 }
 0x236   :  { %968 = vst [vmem:[%s1648_s4 + $0x88] sm:$0xff] %v936_v49  ;;  %v1140_v50 = vpop.f32.mrb[20].mxu1 }
 0x237   :  { %v1141_v51 = vpop.f32.mrb[21].mxu1 }
 0x238   :  { %v1142_v52 = vadd.f32 %v1141_v51, %v1140_v50  ;;  %v1143_v53 = vpop.f32.mrb[22].mxu1 }
 0x239   :  { %v1144_v54 = vpop.f32.mrb[23].mxu1 }
 0x23a   :  { %v937_v55 = vadd.f32 %v1142_v52, %v1514_v43  ;;  %v1145_v56 = vadd.f32 %v1144_v54, %v1143_v53 }
 0x23c   :  { %969 = vst [vmem:[%s1648_s4 + $0x90] sm:$0xff] %v937_v55  ;;  %v938_v57 = vadd.f32 %v1145_v56, %v1514_v43 }
 0x23e   :  { %970 = vst [vmem:[%s1648_s4 + $0x98] sm:$0xff] %v938_v57  ;;  %v1146_v58 = vpop.f32.mrb[24].mxu1 }
 0x23f   :  { %v1147_v59 = vpop.f32.mrb[25].mxu1 }
 0x240   :  { %v1148_v60 = vadd.f32 %v1147_v59, %v1146_v58  ;;  %v1149_v61 = vpop.f32.mrb[26].mxu1 }
 0x241   :  { %v1150_v62 = vpop.f32.mrb[27].mxu1 }
 0x242   :  { %v939_v63 = vadd.f32 %v1148_v60, %v1514_v43  ;;  %v1151_v0 = vadd.f32 %v1150_v62, %v1149_v61 }
 0x244   :  { %971 = vst [vmem:[%s1648_s4 + $0xa0] sm:$0xff] %v939_v63  ;;  %v940_v1 = vadd.f32 %v1151_v0, %v1514_v43 }
 0x246   :  { %972 = vst [vmem:[%s1648_s4 + $0xa8] sm:$0xff] %v940_v1  ;;  %v1152_v2 = vpop.f32.mrb[28].mxu1 }
 0x247   :  { %v1153_v3 = vpop.f32.mrb[29].mxu1 }
 0x248   :  { %v1154_v4 = vadd.f32 %v1153_v3, %v1152_v2  ;;  %v1155_v5 = vpop.f32.mrb[30].mxu1 }
 0x249   :  { %v1156_v6 = vpop.f32.mrb[31].mxu1 }
 0x24a   :  { %v941_v7 = vadd.f32 %v1154_v4, %v1514_v43  ;;  %v1157_v8 = vadd.f32 %v1156_v6, %v1155_v5 }
 0x24c   :  { %973 = vst [vmem:[%s1648_s4 + $0xb0] sm:$0xff] %v941_v7  ;;  %v942_v9 = vadd.f32 %v1157_v8, %v1514_v43 }
 0x24e   :  { %974 = vst [vmem:[%s1648_s4 + $0xb8] sm:$0xff] %v942_v9  ;;  %v1158_v10 = vpop.f32.mrb[32].mxu1 }
 0x24f   :  { %v1159_v11 = vpop.f32.mrb[33].mxu1 }
 0x250   :  { %v1160_v12 = vadd.f32 %v1159_v11, %v1158_v10  ;;  %v1161_v13 = vpop.f32.mrb[34].mxu1 }
 0x251   :  { %v1162_v14 = vpop.f32.mrb[35].mxu1 }
 0x252   :  { %v943_v15 = vadd.f32 %v1160_v12, %v1514_v43  ;;  %v1163_v16 = vadd.f32 %v1162_v14, %v1161_v13 }
 0x254   :  { %975 = vst [vmem:[%s1648_s4 + $0xc0] sm:$0xff] %v943_v15  ;;  %v944_v17 = vadd.f32 %v1163_v16, %v1514_v43 }
 0x256   :  { %976 = vst [vmem:[%s1648_s4 + $0xc8] sm:$0xff] %v944_v17  ;;  %v1164_v18 = vpop.f32.mrb[36].mxu1 }
 0x257   :  { %v1165_v19 = vpop.f32.mrb[37].mxu1 }
 0x258   :  { %v1166_v20 = vadd.f32 %v1165_v19, %v1164_v18  ;;  %v1167_v21 = vpop.f32.mrb[38].mxu1 }
 0x259   :  { %v1168_v22 = vpop.f32.mrb[39].mxu1 }
 0x25a   :  { %v945_v23 = vadd.f32 %v1166_v20, %v1514_v43  ;;  %v1169_v24 = vadd.f32 %v1168_v22, %v1167_v21 }
 0x25c   :  { %977 = vst [vmem:[%s1648_s4 + $0xd0] sm:$0xff] %v945_v23  ;;  %v946_v25 = vadd.f32 %v1169_v24, %v1514_v43 }
 0x25e   :  { %978 = vst [vmem:[%s1648_s4 + $0xd8] sm:$0xff] %v946_v25  ;;  %v1170_v26 = vpop.f32.mrb[40].mxu1 }
 0x25f   :  { %v1171_v27 = vpop.f32.mrb[41].mxu1 }
 0x260   :  { %v1172_v28 = vadd.f32 %v1171_v27, %v1170_v26  ;;  %v1173_v29 = vpop.f32.mrb[42].mxu1 }
 0x261   :  { %v1174_v30 = vpop.f32.mrb[43].mxu1 }
 0x262   :  { %v947_v31 = vadd.f32 %v1172_v28, %v1514_v43  ;;  %v1175_v32 = vadd.f32 %v1174_v30, %v1173_v29 }
 0x264   :  { %979 = vst [vmem:[%s1648_s4 + $0xe0] sm:$0xff] %v947_v31  ;;  %v948_v33 = vadd.f32 %v1175_v32, %v1514_v43 }
 0x266   :  { %980 = vst [vmem:[%s1648_s4 + $0xe8] sm:$0xff] %v948_v33  ;;  %v1176_v34 = vpop.f32.mrb[44].mxu1 }
 0x267   :  { %v1177_v35 = vpop.f32.mrb[45].mxu1 }
 0x268   :  { %v1178_v36 = vadd.f32 %v1177_v35, %v1176_v34  ;;  %v1179_v37 = vpop.f32.mrb[46].mxu1 }
 0x269   :  { %v1180_v38 = vpop.f32.mrb[47].mxu1 }
 0x26a   :  { %v949_v39 = vadd.f32 %v1178_v36, %v1514_v43  ;;  %v1181_v40 = vadd.f32 %v1180_v38, %v1179_v37 }
 0x26c   :  { %981 = vst [vmem:[%s1648_s4 + $0xf0] sm:$0xff] %v949_v39  ;;  %v950_v41 = vadd.f32 %v1181_v40, %v1514_v43 }
 0x26e   :  { %982 = vst [vmem:[%s1648_s4 + $0xf8] sm:$0xff] %v950_v41 }

// kernel: gcn_encoder.2
= control target key start
LH: loop header
LB: loop body
LE: loop exit
PB: predicated region body
PF: predicated region fallthrough
CT: control target
= control target key end

     0   :  { %s1915_s2 = inlined_call_operand.vmem [shape: bf16[128,128], index: 2, kind: input, shape index: {}]   ;;  %s1916_s1 = inlined_call_operand.vmem [shape: bf16[256,128], index: 1, kind: input, shape index: {}]   ;;  %s1917_s0 = inlined_call_operand.vmem [shape: bf16[256,256], index: 0, kind: input, shape index: {}]   ;;  %s1918_s3 = inlined_call_operand.vmem [shape: f32[1,128], index: 3, kind: input, shape index: {}]   ;;  %s1919_s4 = inlined_call_operand.vmem [shape: bf16[256,128], index: 4, kind: output, shape index: {}]  }
   0x1   :  { %v1565_v0 = vld [vmem:[%s1915_s2] sm:$0xff]   ;;  %v1566_v1 = vld [vmem:[%s1915_s2 + $0x8] sm:$0xff]   ;;  %v1567_v2 = vld [vmem:[%s1915_s2 + $0x10] sm:$0xff]  }
   0x2   :  { %1501 = vmatprep.subr.bf16.mxu0 %v1565_v0  ;;  %v1568_v3 = vld [vmem:[%s1915_s2 + $0x18] sm:$0xff]   ;;  %v1573_v4 = vld [vmem:[%s1916_s1] sm:$0xff]   ;;  %v1570_v6 = vld [vmem:[%s1915_s2 + $0x28] sm:$0xff]  }
   0x3   :  { %1502 = vmatpush3.bf16.msra.mxu0 %v1565_v0  ;;  %1517 = vmatprep.mubr.bf16.mxu0 %v1573_v4  ;;  %v1569_v5 = vld [vmem:[%s1915_s2 + $0x20] sm:$0xff]   ;;  %v1571_v7 = vld [vmem:[%s1915_s2 + $0x30] sm:$0xff]   ;;  %v1572_v8 = vld [vmem:[%s1915_s2 + $0x38] sm:$0xff]  }
   0x4   :  { %1503 = vmatprep.subr.bf16.mxu0 %v1566_v1  ;;  %v1574_v9 = vld [vmem:[%s1916_s1 + $0x8] sm:$0xff]   ;;  %v1575_v10 = vld [vmem:[%s1916_s1 + $0x10] sm:$0xff]   ;;  %v1576_v11 = vld [vmem:[%s1916_s1 + $0x18] sm:$0xff]  }
   0x5   :  { %v1577_v12 = vld [vmem:[%s1916_s1 + $0x20] sm:$0xff]   ;;  %v1578_v13 = vld [vmem:[%s1916_s1 + $0x28] sm:$0xff]   ;;  %v1579_v14 = vld [vmem:[%s1916_s1 + $0x30] sm:$0xff]  }
   0x6   :  { %v1580_v15 = vld [vmem:[%s1916_s1 + $0x38] sm:$0xff]   ;;  %v1581_v16 = vld [vmem:[%s1916_s1 + $0x40] sm:$0xff]   ;;  %v1582_v17 = vld [vmem:[%s1916_s1 + $0x48] sm:$0xff]  }
   0x7   :  { %1504 = vmatpush3.bf16.msra.mxu0 %v1566_v1  ;;  %v1583_v18 = vld [vmem:[%s1916_s1 + $0x50] sm:$0xff]   ;;  %v1584_v19 = vld [vmem:[%s1916_s1 + $0x58] sm:$0xff]   ;;  %v1585_v20 = vld [vmem:[%s1916_s1 + $0x60] sm:$0xff]  }
   0x8   :  { %1505 = vmatprep.subr.bf16.mxu0 %v1567_v2  ;;  %v1586_v21 = vld [vmem:[%s1916_s1 + $0x68] sm:$0xff]   ;;  %v1587_v22 = vld [vmem:[%s1916_s1 + $0x70] sm:$0xff]   ;;  %v1588_v23 = vld [vmem:[%s1916_s1 + $0x78] sm:$0xff]  }
   0x9   :  { %v1591_v24 = vld [vmem:[%s1917_s0 + $0x44] ss:$8 sps:$4 sm:$0xff]  }
   0xa   :  { %716 = vmatprep.mubr.bf16.mxu1 %v1591_v24  ;;  %v1615_v25 = vld [vmem:[%s1917_s0 + $0x4] ss:$8 sps:$4 sm:$0xff]  }
   0xb   :  { %1506 = vmatpush3.bf16.msra.mxu0 %v1567_v2  ;;  %v1601_v24 = vld [vmem:[%s1917_s0 + $0x84] ss:$8 sps:$4 sm:$0xff]  }
   0xc   :  { %1507 = vmatprep.subr.bf16.mxu0 %v1568_v3 }
   0xf   :  { %1508 = vmatpush3.bf16.msra.mxu0 %v1568_v3 }
  0x10   :  { %1509 = vmatprep.subr.bf16.mxu0 %v1569_v5 }
  0x13   :  { %1510 = vmatpush3.bf16.msra.mxu0 %v1569_v5 }
  0x14   :  { %1511 = vmatprep.subr.bf16.mxu0 %v1570_v6 }
  0x17   :  { %1512 = vmatpush3.bf16.msra.mxu0 %v1570_v6 }
  0x18   :  { %1513 = vmatprep.subr.bf16.mxu0 %v1571_v7 }
  0x1b   :  { %1514 = vmatpush3.bf16.msra.mxu0 %v1571_v7 }
  0x1c   :  { %1515 = vmatprep.subr.bf16.mxu0 %v1572_v8 }
  0x1f   :  { %1516 = vmatpush3.bf16.msra.mxu0 %v1572_v8 }
  0x22   :  { %1518 = vmatmul.mubr.bf16.vlgmr.msra.gmra.mrb[0].mxu0 %v1574_v9 }
  0x23   :  { %1521 = vmatprep.mubr.bf16.mxu0 %v1575_v10  ;;  %v1589_v10 = vld [vmem:[%s1917_s0 + $0x40] ss:$8 sps:$4 sm:$0xff]  }
  0x2a   :  { %1522 = vmatmul.mubr.bf16.gmra.mrb[4].mxu0 %v1576_v11  ;;  %v1613_v11 = vld [vmem:[%s1917_s0] ss:$8 sps:$4 sm:$0xff]  }
  0x2b   :  { %1525 = vmatprep.mubr.bf16.mxu0 %v1577_v12  ;;  %v1592_v12 = vld [vmem:[%s1917_s0 + $0x54] ss:$8 sps:$4 sm:$0xff]  }
  0x32   :  { %1526 = vmatmul.mubr.bf16.gmra.mrb[8].mxu0 %v1578_v13  ;;  %v1619_v13 = vld [vmem:[%s1917_s0 + $0x14] ss:$8 sps:$4 sm:$0xff]  }
  0x33   :  { %1529 = vmatprep.mubr.bf16.mxu0 %v1579_v14  ;;  %v1594_v14 = vld [vmem:[%s1917_s0 + $0x50] ss:$8 sps:$4 sm:$0xff]  }
  0x3a   :  { %1530 = vmatmul.mubr.bf16.gmra.mrb[12].mxu0 %v1580_v15  ;;  %v1621_v15 = vld [vmem:[%s1917_s0 + $0x10] ss:$8 sps:$4 sm:$0xff]  }
  0x3b   :  { %1533 = vmatprep.mubr.bf16.mxu0 %v1581_v16  ;;  %v1595_v16 = vld [vmem:[%s1917_s0 + $0x64] ss:$8 sps:$4 sm:$0xff]  }
  0x42   :  { %1534 = vmatmul.mubr.bf16.gmra.mrb[16].mxu0 %v1582_v17  ;;  %v1625_v17 = vld [vmem:[%s1917_s0 + $0x24] ss:$8 sps:$4 sm:$0xff]  }
  0x43   :  { %1537 = vmatprep.mubr.bf16.mxu0 %v1583_v18  ;;  %v1597_v18 = vld [vmem:[%s1917_s0 + $0x60] ss:$8 sps:$4 sm:$0xff]  }
  0x4a   :  { %1538 = vmatmul.mubr.bf16.gmra.mrb[20].mxu0 %v1584_v19  ;;  %v1627_v19 = vld [vmem:[%s1917_s0 + $0x20] ss:$8 sps:$4 sm:$0xff]  }
  0x4b   :  { %1541 = vmatprep.mubr.bf16.mxu0 %v1585_v20  ;;  %v1598_v20 = vld [vmem:[%s1917_s0 + $0x74] ss:$8 sps:$4 sm:$0xff]  }
  0x52   :  { %1542 = vmatmul.mubr.bf16.gmra.mrb[24].mxu0 %v1586_v21  ;;  %v1631_v21 = vld [vmem:[%s1917_s0 + $0x34] ss:$8 sps:$4 sm:$0xff]  }
  0x53   :  { %1545 = vmatprep.mubr.bf16.mxu0 %v1587_v22  ;;  %v1600_v22 = vld [vmem:[%s1917_s0 + $0x70] ss:$8 sps:$4 sm:$0xff]  }
  0x5a   :  { %1546 = vmatmul.mubr.bf16.gmra.mrb[28].mxu0 %v1588_v23  ;;  %v1633_v23 = vld [vmem:[%s1917_s0 + $0x30] ss:$8 sps:$4 sm:$0xff]  }
  0x5b   :  { %684 = vmatprep.mubr.bf16.mxu0 %v1615_v25  ;;  %v1603_v25 = vld [vmem:[%s1917_s0 + $0x80] ss:$8 sps:$4 sm:$0xff]  }
  0xf5   :  { %v1519_v26 = vpop.f32.mrb[0].mxu0 }
  0xf6   :  { %v285_v27 = vpop.f32.mrb[1].mxu0 }
  0xf7   :  { %v1520_v28 = vpop.f32.mrb[2].mxu0 }
  0xf8   :  { %v477_v29 = vpack.c.bf16 %v1520_v28, %v1519_v26  ;;  %v288_v30 = vpop.f32.mrb[3].mxu0  ;;  %v1604_v26 = vld [vmem:[%s1917_s0 + $0x94] ss:$8 sps:$4 sm:$0xff]   ;;  %v1607_v28 = vld [vmem:[%s1917_s0 + $0xa4] ss:$8 sps:$4 sm:$0xff]  }
  0xf9   :  { %v476_v31 = vpack.c.bf16 %v288_v30, %v285_v27  ;;  %v1606_v27 = vld [vmem:[%s1917_s0 + $0x90] ss:$8 sps:$4 sm:$0xff]   ;;  %v1610_v30 = vld [vmem:[%s1917_s0 + $0xb4] ss:$8 sps:$4 sm:$0xff]  }
  0xfd   :  { %v1523_v32 = vpop.f32.mrb[4].mxu0 }
  0xfe   :  { %v301_v33 = vpop.f32.mrb[5].mxu0 }
  0xff   :  { %v1524_v34 = vpop.f32.mrb[6].mxu0 }
 0x100   :  { %v479_v35 = vpack.c.bf16 %v1524_v34, %v1523_v32  ;;  %v304_v36 = vpop.f32.mrb[7].mxu0  ;;  %v1616_v32 = vld [vmem:[%s1917_s0 + $0xc4] ss:$8 sps:$4 sm:$0xff]   ;;  %v1622_v34 = vld [vmem:[%s1917_s0 + $0xd4] ss:$8 sps:$4 sm:$0xff]  }
 0x101   :  { %v478_v37 = vpack.c.bf16 %v304_v36, %v301_v33  ;;  %v1618_v33 = vld [vmem:[%s1917_s0 + $0xc0] ss:$8 sps:$4 sm:$0xff]   ;;  %v1628_v36 = vld [vmem:[%s1917_s0 + $0xe4] ss:$8 sps:$4 sm:$0xff]  }
 0x105   :  { %v1527_v38 = vpop.f32.mrb[8].mxu0 }
 0x106   :  { %v317_v39 = vpop.f32.mrb[9].mxu0 }
 0x107   :  { %v1528_v40 = vpop.f32.mrb[10].mxu0 }
 0x108   :  { %v481_v41 = vpack.c.bf16 %v1528_v40, %v1527_v38  ;;  %v320_v42 = vpop.f32.mrb[11].mxu0  ;;  %v1634_v38 = vld [vmem:[%s1917_s0 + $0xf4] ss:$8 sps:$4 sm:$0xff]  }
 0x109   :  { %v480_v43 = vpack.c.bf16 %v320_v42, %v317_v39  ;;  %v1636_v39 = vld [vmem:[%s1917_s0 + $0xf0] ss:$8 sps:$4 sm:$0xff]  }
 0x10d   :  { %v1531_v44 = vpop.f32.mrb[12].mxu0 }
 0x10e   :  { %v333_v45 = vpop.f32.mrb[13].mxu0 }
 0x10f   :  { %v1532_v46 = vpop.f32.mrb[14].mxu0 }
 0x110   :  { %v483_v47 = vpack.c.bf16 %v1532_v46, %v1531_v44  ;;  %v336_v48 = vpop.f32.mrb[15].mxu0 }
 0x111   :  { %v482_v49 = vpack.c.bf16 %v336_v48, %v333_v45 }
 0x115   :  { %v1535_v50 = vpop.f32.mrb[16].mxu0 }
 0x116   :  { %v349_v51 = vpop.f32.mrb[17].mxu0 }
 0x117   :  { %v1536_v52 = vpop.f32.mrb[18].mxu0 }
 0x118   :  { %v485_v53 = vpack.c.bf16 %v1536_v52, %v1535_v50  ;;  %v352_v54 = vpop.f32.mrb[19].mxu0 }
 0x119   :  { %v484_v55 = vpack.c.bf16 %v352_v54, %v349_v51 }
 0x11b   :  { %1389 = vmatprep.subr.bf16.mxu0 %v484_v55  ;;  %1549 = vmatprep.subr.bf16.mxu1 %v484_v55 }
 0x11c   :  { %1390 = vmatpush3.bf16.msra.mxu0 %v476_v31  ;;  %1557 = vmatpush3.bf16.msra.mxu1 %v476_v31  ;;  %v1612_v31 = vld [vmem:[%s1917_s0 + $0xb0] ss:$8 sps:$4 sm:$0xff]  }
 0x11d   :  { %v1539_v56 = vpop.f32.mrb[20].mxu0  ;;  %1391 = vmatprep.subr.bf16.mxu0 %v485_v53  ;;  %1550 = vmatprep.subr.bf16.mxu1 %v485_v53 }
 0x11e   :  { %v365_v57 = vpop.f32.mrb[21].mxu0 }
 0x11f   :  { %v1540_v58 = vpop.f32.mrb[22].mxu0 }
 0x120   :  { %v487_v59 = vpack.c.bf16 %v1540_v58, %v1539_v56  ;;  %v368_v60 = vpop.f32.mrb[23].mxu0  ;;  %1392 = vmatpush3.bf16.msra.mxu0 %v477_v29  ;;  %1558 = vmatpush3.bf16.msra.mxu1 %v477_v29  ;;  %v1609_v29 = vld [vmem:[%s1917_s0 + $0xa0] ss:$8 sps:$4 sm:$0xff]  }
 0x121   :  { %v486_v61 = vpack.c.bf16 %v368_v60, %v365_v57 }
 0x123   :  { %1393 = vmatprep.subr.bf16.mxu0 %v486_v61  ;;  %1551 = vmatprep.subr.bf16.mxu1 %v486_v61 }
 0x124   :  { %1394 = vmatpush3.bf16.msra.mxu0 %v478_v37  ;;  %1559 = vmatpush3.bf16.msra.mxu1 %v478_v37  ;;  %v1630_v37 = vld [vmem:[%s1917_s0 + $0xe0] ss:$8 sps:$4 sm:$0xff]  }
 0x125   :  { %v1543_v62 = vpop.f32.mrb[24].mxu0  ;;  %1395 = vmatprep.subr.bf16.mxu0 %v487_v59  ;;  %1552 = vmatprep.subr.bf16.mxu1 %v487_v59 }
 0x126   :  { %v381_v63 = vpop.f32.mrb[25].mxu0 }
 0x127   :  { %v1544_v0 = vpop.f32.mrb[26].mxu0 }
 0x128   :  { %v489_v1 = vpack.c.bf16 %v1544_v0, %v1543_v62  ;;  %v384_v2 = vpop.f32.mrb[27].mxu0  ;;  %1396 = vmatpush3.bf16.msra.mxu0 %v479_v35  ;;  %1560 = vmatpush3.bf16.msra.mxu1 %v479_v35  ;;  %v1624_v35 = vld [vmem:[%s1917_s0 + $0xd0] ss:$8 sps:$4 sm:$0xff]  }
 0x129   :  { %v488_v3 = vpack.c.bf16 %v384_v2, %v381_v63 }
 0x12b   :  { %1397 = vmatprep.subr.bf16.mxu0 %v488_v3  ;;  %1553 = vmatprep.subr.bf16.mxu1 %v488_v3 }
 0x12c   :  { %1398 = vmatpush3.bf16.msra.mxu0 %v480_v43  ;;  %1561 = vmatpush3.bf16.msra.mxu1 %v480_v43  ;;  %v1833_v43 = vld [vmem:[%s1918_s3] ss:$0 sm:$0xff] }
 0x12d   :  { %v1547_v4 = vpop.f32.mrb[28].mxu0  ;;  %1399 = vmatprep.subr.bf16.mxu0 %v489_v1  ;;  %1554 = vmatprep.subr.bf16.mxu1 %v489_v1 }
 0x12e   :  { %v397_v5 = vpop.f32.mrb[29].mxu0 }
 0x12f   :  { %v1548_v6 = vpop.f32.mrb[30].mxu0 }
 0x130   :  { %v491_v7 = vpack.c.bf16 %v1548_v6, %v1547_v4  ;;  %v400_v8 = vpop.f32.mrb[31].mxu0  ;;  %1400 = vmatpush3.bf16.msra.mxu0 %v481_v41  ;;  %1562 = vmatpush3.bf16.msra.mxu1 %v481_v41 }
 0x131   :  { %v490_v9 = vpack.c.bf16 %v400_v8, %v397_v5 }
 0x133   :  { %1401 = vmatprep.subr.bf16.mxu0 %v490_v9  ;;  %1555 = vmatprep.subr.bf16.mxu1 %v490_v9 }
 0x134   :  { %1402 = vmatpush3.bf16.msra.mxu0 %v482_v49  ;;  %1563 = vmatpush3.bf16.msra.mxu1 %v482_v49 }
 0x135   :  { %1403 = vmatprep.subr.bf16.mxu0 %v491_v7  ;;  %1556 = vmatprep.subr.bf16.mxu1 %v491_v7 }
 0x138   :  { %1404 = vmatpush3.bf16.msra.mxu0 %v483_v47  ;;  %1564 = vmatpush3.bf16.msra.mxu1 %v483_v47 }
 0x13b   :  { %717 = vmatmul.mubr.bf16.vlgmr.msra.gmra.mrb[0].mxu1 %v1589_v10  ;;  %685 = vmatmul.mubr.bf16.vlgmr.msra.gmra.mrb[32].mxu0 %v1613_v11 }
 0x13c   :  { %724 = vmatprep.mubr.bf16.mxu1 %v1592_v12  ;;  %692 = vmatprep.mubr.bf16.mxu0 %v1619_v13 }
 0x143   :  { %725 = vmatmul.mubr.bf16.gmra.mrb[4].mxu1 %v1594_v14  ;;  %693 = vmatmul.mubr.bf16.gmra.mrb[36].mxu0 %v1621_v15 }
 0x144   :  { %732 = vmatprep.mubr.bf16.mxu1 %v1595_v16  ;;  %700 = vmatprep.mubr.bf16.mxu0 %v1625_v17 }
 0x14b   :  { %733 = vmatmul.mubr.bf16.gmra.mrb[8].mxu1 %v1597_v18  ;;  %701 = vmatmul.mubr.bf16.gmra.mrb[40].mxu0 %v1627_v19 }
 0x14c   :  { %740 = vmatprep.mubr.bf16.mxu1 %v1598_v20  ;;  %708 = vmatprep.mubr.bf16.mxu0 %v1631_v21 }
 0x153   :  { %741 = vmatmul.mubr.bf16.gmra.mrb[12].mxu1 %v1600_v22  ;;  %709 = vmatmul.mubr.bf16.gmra.mrb[44].mxu0 %v1633_v23 }
 0x154   :  { %748 = vmatprep.mubr.bf16.mxu1 %v1601_v24 }
 0x15b   :  { %749 = vmatmul.mubr.bf16.gmra.mrb[16].mxu1 %v1603_v25 }
 0x15c   :  { %756 = vmatprep.mubr.bf16.mxu1 %v1604_v26 }
 0x163   :  { %757 = vmatmul.mubr.bf16.gmra.mrb[20].mxu1 %v1606_v27 }
 0x164   :  { %764 = vmatprep.mubr.bf16.mxu1 %v1607_v28 }
 0x16b   :  { %765 = vmatmul.mubr.bf16.gmra.mrb[24].mxu1 %v1609_v29 }
 0x16c   :  { %772 = vmatprep.mubr.bf16.mxu1 %v1610_v30 }
 0x173   :  { %773 = vmatmul.mubr.bf16.gmra.mrb[28].mxu1 %v1612_v31 }
 0x174   :  { %780 = vmatprep.mubr.bf16.mxu1 %v1616_v32 }
 0x17b   :  { %781 = vmatmul.mubr.bf16.gmra.mrb[32].mxu1 %v1618_v33 }
 0x17c   :  { %788 = vmatprep.mubr.bf16.mxu1 %v1622_v34 }
 0x183   :  { %789 = vmatmul.mubr.bf16.gmra.mrb[36].mxu1 %v1624_v35 }
 0x184   :  { %796 = vmatprep.mubr.bf16.mxu1 %v1628_v36 }
 0x18b   :  { %797 = vmatmul.mubr.bf16.gmra.mrb[40].mxu1 %v1630_v37 }
 0x18c   :  { %804 = vmatprep.mubr.bf16.mxu1 %v1634_v38 }
 0x193   :  { %805 = vmatmul.mubr.bf16.gmra.mrb[44].mxu1 %v1636_v39 }
 0x20e   :  { %v1429_v40 = vpop.f32.mrb[0].mxu1  ;;  %v1405_v41 = vpop.f32.mrb[32].mxu0 }
 0x20f   :  { %v1430_v42 = vpop.f32.mrb[1].mxu1  ;;  %v1406_v44 = vpop.f32.mrb[33].mxu0 }
 0x210   :  { %v1431_v45 = vadd.f32 %v1430_v42, %v1429_v40  ;;  %v1432_v46 = vpop.f32.mrb[2].mxu1  ;;  %v1407_v47 = vadd.f32 %v1406_v44, %v1405_v41  ;;  %v1408_v48 = vpop.f32.mrb[34].mxu0 }
 0x211   :  { %v1433_v49 = vpop.f32.mrb[3].mxu1  ;;  %v1409_v50 = vpop.f32.mrb[35].mxu0 }
 0x212   :  { %v927_v51 = vadd.f32 %v1431_v45, %v1833_v43  ;;  %v1434_v52 = vadd.f32 %v1433_v49, %v1432_v46  ;;  %v919_v53 = vadd.f32 %v1407_v47, %v1833_v43  ;;  %v1410_v54 = vadd.f32 %v1409_v50, %v1408_v48 }
 0x214   :  { %v928_v55 = vadd.f32 %v1434_v52, %v1833_v43  ;;  %v951_v56 = vmax.f32 %v919_v53, 0.0  ;;  %v920_v57 = vadd.f32 %v1410_v54, %v1833_v43  ;;  %v959_v58 = vmax.f32 %v927_v51, 0.0 }
 0x216   :  { %v960_v59 = vmax.f32 %v928_v55, 0.0  ;;  %v1435_v60 = vpop.f32.mrb[4].mxu1  ;;  %v952_v61 = vmax.f32 %v920_v57, 0.0  ;;  %v1411_v62 = vpop.f32.mrb[36].mxu0 }
 0x217   :  { %v1436_v63 = vpop.f32.mrb[5].mxu1  ;;  %v1412_v0 = vpop.f32.mrb[37].mxu0 }
 0x218   :  { %v1293_v1 = vpack.c.bf16 %v960_v59, %v959_v58  ;;  %v1437_v2 = vadd.f32 %v1436_v63, %v1435_v60  ;;  %v1438_v3 = vpop.f32.mrb[6].mxu1  ;;  %v1273_v4 = vpack.c.bf16 %v952_v61, %v951_v56  ;;  %v1413_v5 = vadd.f32 %v1412_v0, %v1411_v62  ;;  %v1414_v6 = vpop.f32.mrb[38].mxu0 }
 0x219   :  { %v1439_v7 = vpop.f32.mrb[7].mxu1  ;;  %v1415_v8 = vpop.f32.mrb[39].mxu0 }
 0x21a   :  { %1353 = vst [vmem:[%s1919_s4 + $0x20] sm:$0xff] %v1293_v1   ;;  %v929_v9 = vadd.f32 %v1437_v2, %v1833_v43  ;;  %v1440_v10 = vadd.f32 %v1439_v7, %v1438_v3  ;;  %1274 = vst [vmem:[%s1919_s4] sm:$0xff] %v1273_v4   ;;  %v921_v11 = vadd.f32 %v1413_v5, %v1833_v43 }
 0x21b   :  { %v1416_v12 = vadd.f32 %v1415_v8, %v1414_v6 }
 0x21c   :  { %v930_v13 = vadd.f32 %v1440_v10, %v1833_v43  ;;  %v953_v14 = vmax.f32 %v921_v11, 0.0  ;;  %v961_v16 = vmax.f32 %v929_v9, 0.0 }
 0x21d   :  { %v922_v15 = vadd.f32 %v1416_v12, %v1833_v43 }
 0x21e   :  { %v962_v17 = vmax.f32 %v930_v13, 0.0  ;;  %v1441_v18 = vpop.f32.mrb[8].mxu1  ;;  %v1417_v20 = vpop.f32.mrb[40].mxu0 }
 0x21f   :  { %v954_v19 = vmax.f32 %v922_v15, 0.0  ;;  %v1442_v21 = vpop.f32.mrb[9].mxu1  ;;  %v1418_v22 = vpop.f32.mrb[41].mxu0 }
 0x220   :  { %v1298_v23 = vpack.c.bf16 %v962_v17, %v961_v16  ;;  %v1443_v24 = vadd.f32 %v1442_v21, %v1441_v18  ;;  %v1444_v25 = vpop.f32.mrb[10].mxu1  ;;  %v1419_v27 = vadd.f32 %v1418_v22, %v1417_v20  ;;  %v1420_v28 = vpop.f32.mrb[42].mxu0 }
 0x221   :  { %v1278_v26 = vpack.c.bf16 %v954_v19, %v953_v14  ;;  %v1445_v29 = vpop.f32.mrb[11].mxu1  ;;  %v1421_v30 = vpop.f32.mrb[43].mxu0 }
 0x222   :  { %1354 = vst [vmem:[%s1919_s4 + $0x28] sm:$0xff] %v1298_v23   ;;  %v931_v31 = vadd.f32 %v1443_v24, %v1833_v43  ;;  %v1446_v32 = vadd.f32 %v1445_v29, %v1444_v25  ;;  %v923_v33 = vadd.f32 %v1419_v27, %v1833_v43  ;;  %v1422_v34 = vadd.f32 %v1421_v30, %v1420_v28 }
 0x223   :  { %1350 = vst [vmem:[%s1919_s4 + $0x8] sm:$0xff] %v1278_v26  }
 0x224   :  { %v932_v35 = vadd.f32 %v1446_v32, %v1833_v43  ;;  %v955_v36 = vmax.f32 %v923_v33, 0.0  ;;  %v924_v37 = vadd.f32 %v1422_v34, %v1833_v43  ;;  %v963_v38 = vmax.f32 %v931_v31, 0.0 }
 0x226   :  { %v964_v39 = vmax.f32 %v932_v35, 0.0  ;;  %v1447_v40 = vpop.f32.mrb[12].mxu1  ;;  %v956_v41 = vmax.f32 %v924_v37, 0.0  ;;  %v1423_v42 = vpop.f32.mrb[44].mxu0 }
 0x227   :  { %v1448_v44 = vpop.f32.mrb[13].mxu1  ;;  %v1424_v45 = vpop.f32.mrb[45].mxu0 }
 0x228   :  { %v1303_v46 = vpack.c.bf16 %v964_v39, %v963_v38  ;;  %v1449_v47 = vadd.f32 %v1448_v44, %v1447_v40  ;;  %v1450_v48 = vpop.f32.mrb[14].mxu1  ;;  %v1283_v49 = vpack.c.bf16 %v956_v41, %v955_v36  ;;  %v1425_v50 = vadd.f32 %v1424_v45, %v1423_v42  ;;  %v1426_v51 = vpop.f32.mrb[46].mxu0 }
 0x229   :  { %v1451_v52 = vpop.f32.mrb[15].mxu1  ;;  %v1427_v53 = vpop.f32.mrb[47].mxu0 }
 0x22a   :  { %1355 = vst [vmem:[%s1919_s4 + $0x30] sm:$0xff] %v1303_v46   ;;  %v933_v54 = vadd.f32 %v1449_v47, %v1833_v43  ;;  %v1452_v55 = vadd.f32 %v1451_v52, %v1450_v48  ;;  %1351 = vst [vmem:[%s1919_s4 + $0x10] sm:$0xff] %v1283_v49   ;;  %v925_v56 = vadd.f32 %v1425_v50, %v1833_v43 }
 0x22b   :  { %v1428_v57 = vadd.f32 %v1427_v53, %v1426_v51 }
 0x22c   :  { %v934_v58 = vadd.f32 %v1452_v55, %v1833_v43  ;;  %v957_v59 = vmax.f32 %v925_v56, 0.0  ;;  %v965_v61 = vmax.f32 %v933_v54, 0.0 }
 0x22d   :  { %v926_v60 = vadd.f32 %v1428_v57, %v1833_v43 }
 0x22e   :  { %v966_v62 = vmax.f32 %v934_v58, 0.0  ;;  %v1453_v63 = vpop.f32.mrb[16].mxu1 }
 0x22f   :  { %v958_v0 = vmax.f32 %v926_v60, 0.0  ;;  %v1454_v1 = vpop.f32.mrb[17].mxu1 }
 0x230   :  { %v1308_v2 = vpack.c.bf16 %v966_v62, %v965_v61  ;;  %v1455_v3 = vadd.f32 %v1454_v1, %v1453_v63  ;;  %v1456_v4 = vpop.f32.mrb[18].mxu1 }
 0x231   :  { %v1288_v5 = vpack.c.bf16 %v958_v0, %v957_v59  ;;  %v1457_v6 = vpop.f32.mrb[19].mxu1 }
 0x232   :  { %1356 = vst [vmem:[%s1919_s4 + $0x38] sm:$0xff] %v1308_v2   ;;  %v935_v7 = vadd.f32 %v1455_v3, %v1833_v43  ;;  %v1458_v8 = vadd.f32 %v1457_v6, %v1456_v4 }
 0x233   :  { %1352 = vst [vmem:[%s1919_s4 + $0x18] sm:$0xff] %v1288_v5  }
 0x234   :  { %v936_v9 = vadd.f32 %v1458_v8, %v1833_v43  ;;  %v967_v10 = vmax.f32 %v935_v7, 0.0 }
 0x236   :  { %v968_v11 = vmax.f32 %v936_v9, 0.0  ;;  %v1459_v12 = vpop.f32.mrb[20].mxu1 }
 0x237   :  { %v1460_v13 = vpop.f32.mrb[21].mxu1 }
 0x238   :  { %v1313_v14 = vpack.c.bf16 %v968_v11, %v967_v10  ;;  %v1461_v15 = vadd.f32 %v1460_v13, %v1459_v12  ;;  %v1462_v16 = vpop.f32.mrb[22].mxu1 }
 0x239   :  { %v1463_v17 = vpop.f32.mrb[23].mxu1 }
 0x23a   :  { %1357 = vst [vmem:[%s1919_s4 + $0x40] sm:$0xff] %v1313_v14   ;;  %v937_v18 = vadd.f32 %v1461_v15, %v1833_v43  ;;  %v1464_v19 = vadd.f32 %v1463_v17, %v1462_v16 }
 0x23c   :  { %v938_v20 = vadd.f32 %v1464_v19, %v1833_v43  ;;  %v969_v21 = vmax.f32 %v937_v18, 0.0 }
 0x23e   :  { %v970_v22 = vmax.f32 %v938_v20, 0.0  ;;  %v1465_v23 = vpop.f32.mrb[24].mxu1 }
 0x23f   :  { %v1466_v24 = vpop.f32.mrb[25].mxu1 }
 0x240   :  { %v1318_v25 = vpack.c.bf16 %v970_v22, %v969_v21  ;;  %v1467_v26 = vadd.f32 %v1466_v24, %v1465_v23  ;;  %v1468_v27 = vpop.f32.mrb[26].mxu1 }
 0x241   :  { %v1469_v28 = vpop.f32.mrb[27].mxu1 }
 0x242   :  { %1358 = vst [vmem:[%s1919_s4 + $0x48] sm:$0xff] %v1318_v25   ;;  %v939_v29 = vadd.f32 %v1467_v26, %v1833_v43  ;;  %v1470_v30 = vadd.f32 %v1469_v28, %v1468_v27 }
 0x244   :  { %v940_v31 = vadd.f32 %v1470_v30, %v1833_v43  ;;  %v971_v32 = vmax.f32 %v939_v29, 0.0 }
 0x246   :  { %v972_v33 = vmax.f32 %v940_v31, 0.0  ;;  %v1471_v34 = vpop.f32.mrb[28].mxu1 }
 0x247   :  { %v1472_v35 = vpop.f32.mrb[29].mxu1 }
 0x248   :  { %v1323_v36 = vpack.c.bf16 %v972_v33, %v971_v32  ;;  %v1473_v37 = vadd.f32 %v1472_v35, %v1471_v34  ;;  %v1474_v38 = vpop.f32.mrb[30].mxu1 }
 0x249   :  { %v1475_v39 = vpop.f32.mrb[31].mxu1 }
 0x24a   :  { %1359 = vst [vmem:[%s1919_s4 + $0x50] sm:$0xff] %v1323_v36   ;;  %v941_v40 = vadd.f32 %v1473_v37, %v1833_v43  ;;  %v1476_v41 = vadd.f32 %v1475_v39, %v1474_v38 }
 0x24c   :  { %v942_v42 = vadd.f32 %v1476_v41, %v1833_v43  ;;  %v973_v44 = vmax.f32 %v941_v40, 0.0 }
 0x24e   :  { %v974_v45 = vmax.f32 %v942_v42, 0.0  ;;  %v1477_v46 = vpop.f32.mrb[32].mxu1 }
 0x24f   :  { %v1478_v47 = vpop.f32.mrb[33].mxu1 }
 0x250   :  { %v1328_v48 = vpack.c.bf16 %v974_v45, %v973_v44  ;;  %v1479_v49 = vadd.f32 %v1478_v47, %v1477_v46  ;;  %v1480_v50 = vpop.f32.mrb[34].mxu1 }
 0x251   :  { %v1481_v51 = vpop.f32.mrb[35].mxu1 }
 0x252   :  { %1360 = vst [vmem:[%s1919_s4 + $0x58] sm:$0xff] %v1328_v48   ;;  %v943_v52 = vadd.f32 %v1479_v49, %v1833_v43  ;;  %v1482_v53 = vadd.f32 %v1481_v51, %v1480_v50 }
 0x254   :  { %v944_v54 = vadd.f32 %v1482_v53, %v1833_v43  ;;  %v975_v55 = vmax.f32 %v943_v52, 0.0 }
 0x256   :  { %v976_v56 = vmax.f32 %v944_v54, 0.0  ;;  %v1483_v57 = vpop.f32.mrb[36].mxu1 }
 0x257   :  { %v1484_v58 = vpop.f32.mrb[37].mxu1 }
 0x258   :  { %v1333_v59 = vpack.c.bf16 %v976_v56, %v975_v55  ;;  %v1485_v60 = vadd.f32 %v1484_v58, %v1483_v57  ;;  %v1486_v61 = vpop.f32.mrb[38].mxu1 }
 0x259   :  { %v1487_v62 = vpop.f32.mrb[39].mxu1 }
 0x25a   :  { %1361 = vst [vmem:[%s1919_s4 + $0x60] sm:$0xff] %v1333_v59   ;;  %v945_v63 = vadd.f32 %v1485_v60, %v1833_v43  ;;  %v1488_v0 = vadd.f32 %v1487_v62, %v1486_v61 }
 0x25c   :  { %v946_v1 = vadd.f32 %v1488_v0, %v1833_v43  ;;  %v977_v2 = vmax.f32 %v945_v63, 0.0 }
 0x25e   :  { %v978_v3 = vmax.f32 %v946_v1, 0.0  ;;  %v1489_v4 = vpop.f32.mrb[40].mxu1 }
 0x25f   :  { %v1490_v5 = vpop.f32.mrb[41].mxu1 }
 0x260   :  { %v1338_v6 = vpack.c.bf16 %v978_v3, %v977_v2  ;;  %v1491_v7 = vadd.f32 %v1490_v5, %v1489_v4  ;;  %v1492_v8 = vpop.f32.mrb[42].mxu1 }
 0x261   :  { %v1493_v9 = vpop.f32.mrb[43].mxu1 }
 0x262   :  { %1362 = vst [vmem:[%s1919_s4 + $0x68] sm:$0xff] %v1338_v6   ;;  %v947_v10 = vadd.f32 %v1491_v7, %v1833_v43  ;;  %v1494_v11 = vadd.f32 %v1493_v9, %v1492_v8 }
 0x264   :  { %v948_v12 = vadd.f32 %v1494_v11, %v1833_v43  ;;  %v979_v13 = vmax.f32 %v947_v10, 0.0 }
 0x266   :  { %v980_v14 = vmax.f32 %v948_v12, 0.0  ;;  %v1495_v15 = vpop.f32.mrb[44].mxu1 }
 0x267   :  { %v1496_v16 = vpop.f32.mrb[45].mxu1 }
 0x268   :  { %v1343_v17 = vpack.c.bf16 %v980_v14, %v979_v13  ;;  %v1497_v18 = vadd.f32 %v1496_v16, %v1495_v15  ;;  %v1498_v19 = vpop.f32.mrb[46].mxu1 }
 0x269   :  { %v1499_v20 = vpop.f32.mrb[47].mxu1 }
 0x26a   :  { %1363 = vst [vmem:[%s1919_s4 + $0x70] sm:$0xff] %v1343_v17   ;;  %v949_v21 = vadd.f32 %v1497_v18, %v1833_v43  ;;  %v1500_v22 = vadd.f32 %v1499_v20, %v1498_v19 }
 0x26c   :  { %v950_v23 = vadd.f32 %v1500_v22, %v1833_v43  ;;  %v981_v24 = vmax.f32 %v949_v21, 0.0 }
 0x26e   :  { %v982_v25 = vmax.f32 %v950_v23, 0.0 }
 0x270   :  { %v1348_v26 = vpack.c.bf16 %v982_v25, %v981_v24 }
 0x272   :  { %1364 = vst [vmem:[%s1919_s4 + $0x78] sm:$0xff] %v1348_v26  }

</bundles_post_ra>
